<compile_context>
chip_gen: v6e
topology: v6e:2x2x1
jax: 0.10.0
libtpu: 0.0.40
codegen_flags: <defaults>
</compile_context>

<pallas_src>
import jax
import jax.numpy as jnp
from jax import lax
from jax.experimental import pallas as pl
from jax.experimental.pallas import tpu as pltpu

# ----- model / problem sizes (small, consistent with the module) -------------
BATCH = 8
FEATURE = 64       # feature_size
LATENT = 8         # latent_size
HID1 = 512
HID2 = 256
N_FLOWS = 32
XPAD = 128         # lane-dense padded output width (>= FEATURE)
FLOW_UNROLL = 4    # flow-loop unroll factor (8 chunks x 4 flows)


# ----------------------------- Pallas kernel --------------------------------
def vae_nf_kernel(
    # inputs
    x_ref, eps_ref,
    w1_ref, b1_ref, w2_ref, b2_ref,
    whead_ref, bhead_ref,                    # fused [wlv | wmu], [blv | bmu]
    fu_ref, fw_ref, fb_ref, c_ref, wu_ref,   # flows (fw/fb padded by one)
    wd1_ref, bd1_ref,
    wd2_hbm, bd2_hbm, wd3_hbm, bd3_hbm,      # ANY-space: DMA'd manually
    # outputs
    out_ref,
    # scratch
    wd2_v, bd2_v, wd3_v, bd3_v, dma_sem,
):
    f32 = jnp.float32

    # --- kick off decoder-weight DMAs so they overlap encoder + flow chain ---
    cp_wd2 = pltpu.make_async_copy(wd2_hbm, wd2_v, dma_sem.at[0])
    cp_wd3 = pltpu.make_async_copy(wd3_hbm, wd3_v, dma_sem.at[1])
    cp_bd2 = pltpu.make_async_copy(bd2_hbm, bd2_v, dma_sem.at[2])
    cp_bd3 = pltpu.make_async_copy(bd3_hbm, bd3_v, dma_sem.at[3])
    cp_wd2.start()
    cp_wd3.start()
    cp_bd2.start()
    cp_bd3.start()

    x = x_ref[...]

    # ---------------- encoder: Linear->ReLU->Linear->ReLU -------------------
    h = jnp.maximum(
        jnp.dot(x, w1_ref[...], preferred_element_type=f32) + b1_ref[...], 0.0)
    h = jnp.maximum(
        jnp.dot(h, w2_ref[...], preferred_element_type=f32) + b2_ref[...], 0.0)

    # fused head, ordered [logvar | mu]: logvar at lane 0 (critical path).
    head = jnp.dot(h, whead_ref[...], preferred_element_type=f32) + bhead_ref[...]
    lv = head[:, :LATENT]
    mu = head[:, LATENT:2 * LATENT]

    # ---------------- reparameterization ------------------------------------
    std = jnp.exp(0.5 * lv)
    z = mu + std * eps_ref[...]                      # (B, L)

    # ---------------- 32 planar flows, software-pipelined recurrence --------
    #   arg_{k+1} = z_k . w_{k+1} + b_{k+1} + (u_k . w_{k+1}) * t_k
    # so the XLU lane-reduce (pre_{k+1}) only depends on z_k and overlaps the
    # EUP tanh of step k; the serial chain is tanh -> FMA -> tanh.
    lane = lax.broadcasted_iota(jnp.int32, (BATCH, N_FLOWS), 1)
    t_all0 = jnp.zeros((BATCH, N_FLOWS), f32)
    arg0 = jnp.sum(z * fw_ref[0], axis=-1, keepdims=True) + fb_ref[0]

    def chunk(i, carry):
        z, arg, t_all = carry
        for j in range(FLOW_UNROLL):
            k = i * FLOW_UNROLL + j
            # off-chain: pre-reduction for the NEXT step (uses z_k only).
            pre_next = (jnp.sum(z * fw_ref[k + 1], axis=-1, keepdims=True)
                        + fb_ref[k + 1])
            # serial chain
            t = jnp.tanh(arg)                        # (B, 1)
            arg = pre_next + c_ref[k] * t
            # off-chain: z update + record t_k for the deferred log-det.
            z = z + fu_ref[k] * t
            t_all = jnp.where(lane == k, t, t_all)
        return z, arg, t_all

    z, _, t_all = lax.fori_loop(0, N_FLOWS // FLOW_UNROLL, chunk,
                                (z, arg0, t_all0))

    # deferred log-abs-det:  det_k = 1 + (1 - t_k^2) * (w_k . u_k)
    det = 1.0 + (1.0 - t_all * t_all) * wu_ref[...]  # (B, N_FLOWS)
    slad_total = jnp.sum(jnp.log(jnp.abs(det)))      # sum over batch and flows

    # ---------------- KL -----------------------------------------------------
    kl = -0.5 * jnp.sum(1.0 + lv - mu * mu - jnp.exp(lv)) - slad_total

    # ---------------- decoder: Linear->ReLU->Linear->ReLU->Linear->sigmoid ---
    h = jnp.maximum(
        jnp.dot(z, wd1_ref[...], preferred_element_type=f32) + bd1_ref[...], 0.0)
    cp_wd2.wait()
    cp_bd2.wait()
    h = jnp.maximum(
        jnp.dot(h, wd2_v[...], preferred_element_type=f32) + bd2_v[...], 0.0)
    cp_wd3.wait()
    cp_bd3.wait()
    logits = jnp.dot(h, wd3_v[...], preferred_element_type=f32) + bd3_v[...]
    sig = jax.nn.sigmoid(logits)                     # (B, 128)

    # single lane-dense store; KL stashed in row 0, lane FEATURE (padding lane)
    row = lax.broadcasted_iota(jnp.int32, (BATCH, XPAD), 0)
    col = lax.broadcasted_iota(jnp.int32, (BATCH, XPAD), 1)
    out_ref[...] = jnp.where((row == 0) & (col == FEATURE), kl, sig)


# ------------------------------ wrapper --------------------------------------
@jax.jit
def vae_nf_forward(x, eps, params):
    # One-shot parameter massaging in plain XLA (outside the kernel):
    whead = jnp.concatenate([params["wlv"], params["wmu"]], axis=1)   # (HID2, 2L)
    bhead = jnp.concatenate([params["blv"], params["bmu"]], axis=1)   # (1, 2L)

    fu_b = jnp.broadcast_to(params["fu"][:, None, :], (N_FLOWS, BATCH, LATENT))
    fw_pad = jnp.concatenate(
        [params["fw"], jnp.zeros((1, LATENT), jnp.float32)], axis=0)  # (NF+1, L)
    fw_b = jnp.broadcast_to(fw_pad[:, None, :], (N_FLOWS + 1, BATCH, LATENT))
    fb_pad = jnp.concatenate(
        [params["fb"][:, 0], jnp.zeros((1,), jnp.float32)], axis=0)   # (NF+1,)
    # c[k] = u_k . w_{k+1}  (c[NF-1] hits the zero pad -> 0, unused)
    c = jnp.sum(params["fu"] * fw_pad[1:], axis=-1)                   # (NF,)
    wu = jnp.sum(params["fw"] * params["fu"], axis=-1)[None, :]       # (1, NF)

    wd3p = jnp.pad(params["wd3"], ((0, 0), (0, XPAD - FEATURE)))      # lane-dense
    bd3p = jnp.pad(params["bd3"], ((0, 0), (0, XPAD - FEATURE)))

    vmem = pl.BlockSpec(memory_space=pltpu.MemorySpace.VMEM)
    smem = pl.BlockSpec(memory_space=pltpu.MemorySpace.SMEM)
    hbm = pl.BlockSpec(memory_space=pl.ANY)   # manual DMA inside kernel

    in_specs = [
        vmem, vmem,                          # x, eps
        vmem, vmem, vmem, vmem,              # w1, b1, w2, b2
        vmem, vmem,                          # whead, bhead
        vmem, vmem, smem, smem, vmem,        # fu_b, fw_b, fb_pad, c, wu
        vmem, vmem,                          # wd1, bd1
        hbm, hbm, hbm, hbm,                  # wd2, bd2, wd3p, bd3p (async)
    ]

    out = pl.pallas_call(
        vae_nf_kernel,
        out_shape=jax.ShapeDtypeStruct((BATCH, XPAD), jnp.float32),
        in_specs=in_specs,
        out_specs=vmem,
        scratch_shapes=[
            pltpu.VMEM((HID2, HID1), jnp.float32),   # wd2
            pltpu.VMEM((1, HID1), jnp.float32),      # bd2
            pltpu.VMEM((HID1, XPAD), jnp.float32),   # wd3 (padded)
            pltpu.VMEM((1, XPAD), jnp.float32),      # bd3 (padded)
            pltpu.SemaphoreType.DMA((4,)),
        ],
    )(x, eps,
      params["w1"], params["b1"], params["w2"], params["b2"],
      whead, bhead,
      fu_b, fw_b, fb_pad, c, wu,
      params["wd1"], params["bd1"],
      params["wd2"], params["bd2"], wd3p, bd3p)

    x_hat = out[:, :FEATURE]
    kl = out[0, FEATURE]
    return x_hat, kl


# -------------------------- parameter construction ---------------------------
def init_params(key):
    ks = jax.random.split(key, 20)
    s = 0.05           # deterministic synthetic init (not a checkpoint load)
    flow_sigma = 0.01  # PlanarFlow init_sigma

    def nrm(k, shape, scale):
        return (jax.random.normal(k, shape, jnp.float32) * scale).astype(jnp.float32)

    params = {
        # encoder
        "w1": nrm(ks[0], (FEATURE, HID1), s),
        "b1": nrm(ks[1], (1, HID1), s),
        "w2": nrm(ks[2], (HID1, HID2), s),
        "b2": nrm(ks[3], (1, HID2), s),
        "wmu": nrm(ks[4], (HID2, LATENT), s),
        "bmu": nrm(ks[5], (1, LATENT), s),
        "wlv": nrm(ks[6], (HID2, LATENT), s),
        "blv": nrm(ks[7], (1, LATENT), s),
        # 32 planar flows: u, w ~ N(0, init_sigma), b = 0
        "fu": nrm(ks[8], (N_FLOWS, LATENT), flow_sigma),
        "fw": nrm(ks[9], (N_FLOWS, LATENT), flow_sigma),
        "fb": jnp.zeros((N_FLOWS, 1), jnp.float32),
        # decoder
        "wd1": nrm(ks[10], (LATENT, HID2), s),
        "bd1": nrm(ks[11], (1, HID2), s),
        "wd2": nrm(ks[12], (HID2, HID1), s),
        "bd2": nrm(ks[13], (1, HID1), s),
        "wd3": nrm(ks[14], (HID1, FEATURE), s),
        "bd3": nrm(ks[15], (1, FEATURE), s),
        # gamma exists in the module but is unused in forward().
    }
    return params


# ----------------------- pure-JAX reference (for check) ----------------------
def reference_forward(x, eps, p):
    relu = jax.nn.relu
    h = relu(x @ p["w1"] + p["b1"])
    h = relu(h @ p["w2"] + p["b2"])
    mu = h @ p["wmu"] + p["bmu"]
    lv = h @ p["wlv"] + p["blv"]
    z = mu + jnp.exp(0.5 * lv) * eps
    slad = jnp.zeros((BATCH,), jnp.float32)
    for k in range(N_FLOWS):
        u = p["fu"][k:k + 1]
        w = p["fw"][k:k + 1]
        b = p["fb"][k, 0]
        arg = z @ w.T + b
        t = jnp.tanh(arg)
        z = z + u * t
        psi = w * (1.0 - t ** 2)
        slad = slad + jnp.log(jnp.abs(1.0 + (psi @ u.T)[:, 0]))
    kl = -0.5 * jnp.sum(1.0 + lv - mu ** 2 - jnp.exp(lv)) - jnp.sum(slad)
    h = relu(z @ p["wd1"] + p["bd1"])
    h = relu(h @ p["wd2"] + p["bd2"])
    x_hat = jax.nn.sigmoid(h @ p["wd3"] + p["bd3"])
    return x_hat, kl


# ---------------------------------- main --------------------------------------
if __name__ == "__main__":
    key = jax.random.PRNGKey(0)
    k_x, k_eps, k_param = jax.random.split(key, 3)

    x = jax.random.uniform(k_x, (BATCH, FEATURE), jnp.float32)       # input data
    eps = jax.random.normal(k_eps, (BATCH, LATENT), jnp.float32)     # reparam noise
    params = init_params(k_param)

    x_hat, kl = vae_nf_forward(x, eps, params)
    jax.block_until_ready((x_hat, kl))

    # sanity check against a pure-JAX reference of the PyTorch forward pass
    x_hat_ref, kl_ref_val = reference_forward(x, eps, params)
    assert x_hat.shape == (BATCH, FEATURE)
    assert jnp.allclose(x_hat, x_hat_ref, atol=1e-4, rtol=1e-4)
    assert jnp.allclose(kl, kl_ref_val, atol=1e-3, rtol=1e-4)

    print("KERNEL_OK")
</pallas_src>

<mosaic_0001>
module attributes {stable_mosaic.version = 11 : i64} {
  func.func @vae_nf_kernel(%arg0: memref<8x64xf32, #tpu.memory_space<vmem>>, %arg1: memref<8x8xf32, #tpu.memory_space<vmem>>, %arg2: memref<64x512xf32, #tpu.memory_space<vmem>>, %arg3: memref<1x512xf32, #tpu.memory_space<vmem>>, %arg4: memref<512x256xf32, #tpu.memory_space<vmem>>, %arg5: memref<1x256xf32, #tpu.memory_space<vmem>>, %arg6: memref<256x16xf32, #tpu.memory_space<vmem>>, %arg7: memref<1x16xf32, #tpu.memory_space<vmem>>, %arg8: memref<32x8x8xf32, #tpu.memory_space<vmem>>, %arg9: memref<33x8x8xf32, #tpu.memory_space<vmem>>, %arg10: memref<33xf32, #tpu.memory_space<smem>>, %arg11: memref<32xf32, #tpu.memory_space<smem>>, %arg12: memref<1x32xf32, #tpu.memory_space<vmem>>, %arg13: memref<8x256xf32, #tpu.memory_space<vmem>>, %arg14: memref<1x256xf32, #tpu.memory_space<vmem>>, %arg15: memref<256x512xf32, #tpu.memory_space<any>>, %arg16: memref<1x512xf32, #tpu.memory_space<any>>, %arg17: memref<512x128xf32, #tpu.memory_space<any>>, %arg18: memref<1x128xf32, #tpu.memory_space<any>>, %arg19: memref<8x128xf32, #tpu.memory_space<vmem>>, %arg20: memref<256x512xf32, #tpu.memory_space<vmem>>, %arg21: memref<1x512xf32, #tpu.memory_space<vmem>>, %arg22: memref<512x128xf32, #tpu.memory_space<vmem>>, %arg23: memref<1x128xf32, #tpu.memory_space<vmem>>, %arg24: memref<4x!tpu.dma_semaphore, #tpu.memory_space<semaphore_mem>>) attributes {dimension_semantics = [], scalar_prefetch = 0 : i64, scratch_operands = 5 : i64, tpu.core_type = #tpu.core_type<tc>} {
    %c0_i32 = arith.constant 0 : i32
    %0 = tpu.memref_slice %arg24[%c0_i32] : memref<4x!tpu.dma_semaphore, #tpu.memory_space<semaphore_mem>> -> memref<1x!tpu.dma_semaphore, #tpu.memory_space<semaphore_mem>>
    %1 = tpu.memref_squeeze %0 : memref<1x!tpu.dma_semaphore, #tpu.memory_space<semaphore_mem>> -> memref<!tpu.dma_semaphore, #tpu.memory_space<semaphore_mem>>
    tpu.enqueue_dma source(%arg15 : memref<256x512xf32, #tpu.memory_space<any>>) target(%arg20 : memref<256x512xf32, #tpu.memory_space<vmem>>) target_semaphore(%1 : memref<!tpu.dma_semaphore, #tpu.memory_space<semaphore_mem>>)
    %c1_i32 = arith.constant 1 : i32
    %2 = tpu.memref_slice %arg24[%c1_i32] : memref<4x!tpu.dma_semaphore, #tpu.memory_space<semaphore_mem>> -> memref<1x!tpu.dma_semaphore, #tpu.memory_space<semaphore_mem>>
    %3 = tpu.memref_squeeze %2 : memref<1x!tpu.dma_semaphore, #tpu.memory_space<semaphore_mem>> -> memref<!tpu.dma_semaphore, #tpu.memory_space<semaphore_mem>>
    tpu.enqueue_dma source(%arg17 : memref<512x128xf32, #tpu.memory_space<any>>) target(%arg22 : memref<512x128xf32, #tpu.memory_space<vmem>>) target_semaphore(%3 : memref<!tpu.dma_semaphore, #tpu.memory_space<semaphore_mem>>)
    %c2_i32 = arith.constant 2 : i32
    %4 = tpu.memref_slice %arg24[%c2_i32] : memref<4x!tpu.dma_semaphore, #tpu.memory_space<semaphore_mem>> -> memref<1x!tpu.dma_semaphore, #tpu.memory_space<semaphore_mem>>
    %5 = tpu.memref_squeeze %4 : memref<1x!tpu.dma_semaphore, #tpu.memory_space<semaphore_mem>> -> memref<!tpu.dma_semaphore, #tpu.memory_space<semaphore_mem>>
    tpu.enqueue_dma source(%arg16 : memref<1x512xf32, #tpu.memory_space<any>>) target(%arg21 : memref<1x512xf32, #tpu.memory_space<vmem>>) target_semaphore(%5 : memref<!tpu.dma_semaphore, #tpu.memory_space<semaphore_mem>>)
    %c3_i32 = arith.constant 3 : i32
    %6 = tpu.memref_slice %arg24[%c3_i32] : memref<4x!tpu.dma_semaphore, #tpu.memory_space<semaphore_mem>> -> memref<1x!tpu.dma_semaphore, #tpu.memory_space<semaphore_mem>>
    %7 = tpu.memref_squeeze %6 : memref<1x!tpu.dma_semaphore, #tpu.memory_space<semaphore_mem>> -> memref<!tpu.dma_semaphore, #tpu.memory_space<semaphore_mem>>
    tpu.enqueue_dma source(%arg18 : memref<1x128xf32, #tpu.memory_space<any>>) target(%arg23 : memref<1x128xf32, #tpu.memory_space<vmem>>) target_semaphore(%7 : memref<!tpu.dma_semaphore, #tpu.memory_space<semaphore_mem>>)
    %c0 = arith.constant 0 : index
    %c0_0 = arith.constant 0 : index
    %8 = vector.load %arg0[%c0, %c0_0] : memref<8x64xf32, #tpu.memory_space<vmem>>, vector<8x64xf32>
    %c0_1 = arith.constant 0 : index
    %c0_2 = arith.constant 0 : index
    %9 = vector.load %arg2[%c0_1, %c0_2] : memref<64x512xf32, #tpu.memory_space<vmem>>, vector<64x512xf32>
    %cst = arith.constant dense<0.000000e+00> : vector<8x512xf32>
    %10 = tpu.matmul %8, %9, %cst {dimension_numbers = #tpu.dot_dimension_numbers<[1], [0], [0], [1], [0, 0, 1, 1], [], []>} : vector<8x64xf32>, vector<64x512xf32>, vector<8x512xf32> -> vector<8x512xf32>
    %c0_3 = arith.constant 0 : index
    %c0_4 = arith.constant 0 : index
    %11 = vector.load %arg3[%c0_3, %c0_4] : memref<1x512xf32, #tpu.memory_space<vmem>>, vector<1x512xf32>
    %12 = vector.broadcast %11 : vector<1x512xf32> to vector<8x512xf32>
    %13 = arith.addf %10, %12 : vector<8x512xf32>
    %cst_5 = arith.constant 0.000000e+00 : f32
    %14 = vector.broadcast %cst_5 : f32 to vector<8x512xf32>
    %15 = arith.maximumf %13, %14 : vector<8x512xf32>
    %c0_6 = arith.constant 0 : index
    %c0_7 = arith.constant 0 : index
    %16 = vector.load %arg4[%c0_6, %c0_7] : memref<512x256xf32, #tpu.memory_space<vmem>>, vector<512x256xf32>
    %cst_8 = arith.constant dense<0.000000e+00> : vector<8x256xf32>
    %17 = tpu.matmul %15, %16, %cst_8 {dimension_numbers = #tpu.dot_dimension_numbers<[1], [0], [0], [1], [0, 0, 1, 1], [], []>} : vector<8x512xf32>, vector<512x256xf32>, vector<8x256xf32> -> vector<8x256xf32>
    %c0_9 = arith.constant 0 : index
    %c0_10 = arith.constant 0 : index
    %18 = vector.load %arg5[%c0_9, %c0_10] : memref<1x256xf32, #tpu.memory_space<vmem>>, vector<1x256xf32>
    %19 = vector.broadcast %18 : vector<1x256xf32> to vector<8x256xf32>
    %20 = arith.addf %17, %19 : vector<8x256xf32>
    %cst_11 = arith.constant 0.000000e+00 : f32
    %21 = vector.broadcast %cst_11 : f32 to vector<8x256xf32>
    %22 = arith.maximumf %20, %21 : vector<8x256xf32>
    %c0_12 = arith.constant 0 : index
    %c0_13 = arith.constant 0 : index
    %23 = vector.load %arg6[%c0_12, %c0_13] : memref<256x16xf32, #tpu.memory_space<vmem>>, vector<256x16xf32>
    %cst_14 = arith.constant dense<0.000000e+00> : vector<8x16xf32>
    %24 = tpu.matmul %22, %23, %cst_14 {dimension_numbers = #tpu.dot_dimension_numbers<[1], [0], [0], [1], [0, 0, 1, 1], [], []>} : vector<8x256xf32>, vector<256x16xf32>, vector<8x16xf32> -> vector<8x16xf32>
    %c0_15 = arith.constant 0 : index
    %c0_16 = arith.constant 0 : index
    %25 = vector.load %arg7[%c0_15, %c0_16] : memref<1x16xf32, #tpu.memory_space<vmem>>, vector<1x16xf32>
    %26 = vector.broadcast %25 : vector<1x16xf32> to vector<8x16xf32>
    %27 = arith.addf %24, %26 : vector<8x16xf32>
    %28 = vector.extract_strided_slice %27 {offsets = [0, 0], sizes = [8, 8], strides = [1, 1]} : vector<8x16xf32> to vector<8x8xf32>
    %29 = vector.extract_strided_slice %27 {offsets = [0, 8], sizes = [8, 8], strides = [1, 1]} : vector<8x16xf32> to vector<8x8xf32>
    %cst_17 = arith.constant 5.000000e-01 : f32
    %30 = vector.broadcast %cst_17 : f32 to vector<8x8xf32>
    %31 = arith.mulf %30, %28 : vector<8x8xf32>
    %32 = math.exp %31 : vector<8x8xf32>
    %c0_18 = arith.constant 0 : index
    %c0_19 = arith.constant 0 : index
    %33 = vector.load %arg1[%c0_18, %c0_19] : memref<8x8xf32, #tpu.memory_space<vmem>>, vector<8x8xf32>
    %34 = arith.mulf %32, %33 : vector<8x8xf32>
    %35 = arith.addf %29, %34 : vector<8x8xf32>
    %36 = tpu.iota {dimensions = array<i32: 1>} : vector<8x32xi32>
    %cst_20 = arith.constant 0.000000e+00 : f32
    %37 = vector.broadcast %cst_20 : f32 to vector<8x32xf32>
    %c0_21 = arith.constant 0 : index
    %c0_22 = arith.constant 0 : index
    %c0_23 = arith.constant 0 : index
    %38 = vector.load %arg9[%c0_21, %c0_22, %c0_23] : memref<33x8x8xf32, #tpu.memory_space<vmem>>, vector<1x8x8xf32>
    %39 = vector.shape_cast %38 : vector<1x8x8xf32> to vector<8x8xf32>
    %40 = arith.mulf %35, %39 : vector<8x8xf32>
    %cst_24 = arith.constant dense<0.000000e+00> : vector<8xf32>
    %41 = vector.multi_reduction <add>, %40, %cst_24 [1] : vector<8x8xf32> to vector<8xf32>
    %42 = vector.shape_cast %41 : vector<8xf32> to vector<8x1xf32>
    %c0_25 = arith.constant 0 : index
    %43 = memref.load %arg10[%c0_25] : memref<33xf32, #tpu.memory_space<smem>>
    %44 = vector.broadcast %43 : f32 to vector<8x1xf32>
    %45 = arith.addf %42, %44 : vector<8x1xf32>
    %c0_i32_26 = arith.constant 0 : i32
    %c8_i32 = arith.constant 8 : i32
    %46 = arith.addi %c0_i32_26, %c8_i32 : i32
    %c1_i32_27 = arith.constant 1 : i32
    %47:3 = scf.for %arg25 = %c0_i32_26 to %46 step %c1_i32_27 iter_args(%arg26 = %35, %arg27 = %45, %arg28 = %37) -> (vector<8x8xf32>, vector<8x1xf32>, vector<8x32xf32>)  : i32 {
      %c4_i32 = arith.constant 4 : i32
      %116 = arith.muli %arg25, %c4_i32 : i32
      %c0_i32_62 = arith.constant 0 : i32
      %117 = arith.addi %116, %c0_i32_62 : i32
      %c1_i32_63 = arith.constant 1 : i32
      %118 = arith.addi %117, %c1_i32_63 : i32
      %119 = arith.index_cast %118 : i32 to index
      %c0_64 = arith.constant 0 : index
      %c0_65 = arith.constant 0 : index
      %120 = vector.load %arg9[%119, %c0_64, %c0_65] : memref<33x8x8xf32, #tpu.memory_space<vmem>>, vector<1x8x8xf32>
      %121 = vector.shape_cast %120 : vector<1x8x8xf32> to vector<8x8xf32>
      %122 = arith.mulf %arg26, %121 : vector<8x8xf32>
      %cst_66 = arith.constant dense<0.000000e+00> : vector<8xf32>
      %123 = vector.multi_reduction <add>, %122, %cst_66 [1] : vector<8x8xf32> to vector<8xf32>
      %124 = vector.shape_cast %123 : vector<8xf32> to vector<8x1xf32>
      %c1_i32_67 = arith.constant 1 : i32
      %125 = arith.addi %117, %c1_i32_67 : i32
      %126 = arith.index_cast %125 : i32 to index
      %127 = memref.load %arg10[%126] : memref<33xf32, #tpu.memory_space<smem>>
      %128 = vector.broadcast %127 : f32 to vector<8x1xf32>
      %129 = arith.addf %124, %128 : vector<8x1xf32>
      %130 = math.tanh %arg27 : vector<8x1xf32>
      %131 = arith.index_cast %117 : i32 to index
      %132 = memref.load %arg11[%131] : memref<32xf32, #tpu.memory_space<smem>>
      %133 = vector.broadcast %132 : f32 to vector<8x1xf32>
      %134 = arith.mulf %133, %130 : vector<8x1xf32>
      %135 = arith.addf %129, %134 : vector<8x1xf32>
      %136 = arith.index_cast %117 : i32 to index
      %c0_68 = arith.constant 0 : index
      %c0_69 = arith.constant 0 : index
      %137 = vector.load %arg8[%136, %c0_68, %c0_69] : memref<32x8x8xf32, #tpu.memory_space<vmem>>, vector<1x8x8xf32>
      %138 = vector.shape_cast %137 : vector<1x8x8xf32> to vector<8x8xf32>
      %139 = vector.broadcast %130 : vector<8x1xf32> to vector<8x8xf32>
      %140 = arith.mulf %138, %139 : vector<8x8xf32>
      %141 = arith.addf %arg26, %140 : vector<8x8xf32>
      %142 = vector.broadcast %117 : i32 to vector<8x32xi32>
      %143 = arith.cmpi eq, %36, %142 : vector<8x32xi32>
      %144 = vector.shape_cast %130 : vector<8x1xf32> to vector<8x1xf32>
      %145 = vector.broadcast %144 : vector<8x1xf32> to vector<8x32xf32>
      %146 = arith.select %143, %145, %arg28 : vector<8x32xi1>, vector<8x32xf32>
      %c4_i32_70 = arith.constant 4 : i32
      %147 = arith.muli %arg25, %c4_i32_70 : i32
      %c1_i32_71 = arith.constant 1 : i32
      %148 = arith.addi %147, %c1_i32_71 : i32
      %c1_i32_72 = arith.constant 1 : i32
      %149 = arith.addi %148, %c1_i32_72 : i32
      %150 = arith.index_cast %149 : i32 to index
      %c0_73 = arith.constant 0 : index
      %c0_74 = arith.constant 0 : index
      %151 = vector.load %arg9[%150, %c0_73, %c0_74] : memref<33x8x8xf32, #tpu.memory_space<vmem>>, vector<1x8x8xf32>
      %152 = vector.shape_cast %151 : vector<1x8x8xf32> to vector<8x8xf32>
      %153 = arith.mulf %141, %152 : vector<8x8xf32>
      %cst_75 = arith.constant dense<0.000000e+00> : vector<8xf32>
      %154 = vector.multi_reduction <add>, %153, %cst_75 [1] : vector<8x8xf32> to vector<8xf32>
      %155 = vector.shape_cast %154 : vector<8xf32> to vector<8x1xf32>
      %c1_i32_76 = arith.constant 1 : i32
      %156 = arith.addi %148, %c1_i32_76 : i32
      %157 = arith.index_cast %156 : i32 to index
      %158 = memref.load %arg10[%157] : memref<33xf32, #tpu.memory_space<smem>>
      %159 = vector.broadcast %158 : f32 to vector<8x1xf32>
      %160 = arith.addf %155, %159 : vector<8x1xf32>
      %161 = math.tanh %135 : vector<8x1xf32>
      %162 = arith.index_cast %148 : i32 to index
      %163 = memref.load %arg11[%162] : memref<32xf32, #tpu.memory_space<smem>>
      %164 = vector.broadcast %163 : f32 to vector<8x1xf32>
      %165 = arith.mulf %164, %161 : vector<8x1xf32>
      %166 = arith.addf %160, %165 : vector<8x1xf32>
      %167 = arith.index_cast %148 : i32 to index
      %c0_77 = arith.constant 0 : index
      %c0_78 = arith.constant 0 : index
      %168 = vector.load %arg8[%167, %c0_77, %c0_78] : memref<32x8x8xf32, #tpu.memory_space<vmem>>, vector<1x8x8xf32>
      %169 = vector.shape_cast %168 : vector<1x8x8xf32> to vector<8x8xf32>
      %170 = vector.broadcast %161 : vector<8x1xf32> to vector<8x8xf32>
      %171 = arith.mulf %169, %170 : vector<8x8xf32>
      %172 = arith.addf %141, %171 : vector<8x8xf32>
      %173 = vector.broadcast %148 : i32 to vector<8x32xi32>
      %174 = arith.cmpi eq, %36, %173 : vector<8x32xi32>
      %175 = vector.shape_cast %161 : vector<8x1xf32> to vector<8x1xf32>
      %176 = vector.broadcast %175 : vector<8x1xf32> to vector<8x32xf32>
      %177 = arith.select %174, %176, %146 : vector<8x32xi1>, vector<8x32xf32>
      %c4_i32_79 = arith.constant 4 : i32
      %178 = arith.muli %arg25, %c4_i32_79 : i32
      %c2_i32_80 = arith.constant 2 : i32
      %179 = arith.addi %178, %c2_i32_80 : i32
      %c1_i32_81 = arith.constant 1 : i32
      %180 = arith.addi %179, %c1_i32_81 : i32
      %181 = arith.index_cast %180 : i32 to index
      %c0_82 = arith.constant 0 : index
      %c0_83 = arith.constant 0 : index
      %182 = vector.load %arg9[%181, %c0_82, %c0_83] : memref<33x8x8xf32, #tpu.memory_space<vmem>>, vector<1x8x8xf32>
      %183 = vector.shape_cast %182 : vector<1x8x8xf32> to vector<8x8xf32>
      %184 = arith.mulf %172, %183 : vector<8x8xf32>
      %cst_84 = arith.constant dense<0.000000e+00> : vector<8xf32>
      %185 = vector.multi_reduction <add>, %184, %cst_84 [1] : vector<8x8xf32> to vector<8xf32>
      %186 = vector.shape_cast %185 : vector<8xf32> to vector<8x1xf32>
      %c1_i32_85 = arith.constant 1 : i32
      %187 = arith.addi %179, %c1_i32_85 : i32
      %188 = arith.index_cast %187 : i32 to index
      %189 = memref.load %arg10[%188] : memref<33xf32, #tpu.memory_space<smem>>
      %190 = vector.broadcast %189 : f32 to vector<8x1xf32>
      %191 = arith.addf %186, %190 : vector<8x1xf32>
      %192 = math.tanh %166 : vector<8x1xf32>
      %193 = arith.index_cast %179 : i32 to index
      %194 = memref.load %arg11[%193] : memref<32xf32, #tpu.memory_space<smem>>
      %195 = vector.broadcast %194 : f32 to vector<8x1xf32>
      %196 = arith.mulf %195, %192 : vector<8x1xf32>
      %197 = arith.addf %191, %196 : vector<8x1xf32>
      %198 = arith.index_cast %179 : i32 to index
      %c0_86 = arith.constant 0 : index
      %c0_87 = arith.constant 0 : index
      %199 = vector.load %arg8[%198, %c0_86, %c0_87] : memref<32x8x8xf32, #tpu.memory_space<vmem>>, vector<1x8x8xf32>
      %200 = vector.shape_cast %199 : vector<1x8x8xf32> to vector<8x8xf32>
      %201 = vector.broadcast %192 : vector<8x1xf32> to vector<8x8xf32>
      %202 = arith.mulf %200, %201 : vector<8x8xf32>
      %203 = arith.addf %172, %202 : vector<8x8xf32>
      %204 = vector.broadcast %179 : i32 to vector<8x32xi32>
      %205 = arith.cmpi eq, %36, %204 : vector<8x32xi32>
      %206 = vector.shape_cast %192 : vector<8x1xf32> to vector<8x1xf32>
      %207 = vector.broadcast %206 : vector<8x1xf32> to vector<8x32xf32>
      %208 = arith.select %205, %207, %177 : vector<8x32xi1>, vector<8x32xf32>
      %c4_i32_88 = arith.constant 4 : i32
      %209 = arith.muli %arg25, %c4_i32_88 : i32
      %c3_i32_89 = arith.constant 3 : i32
      %210 = arith.addi %209, %c3_i32_89 : i32
      %c1_i32_90 = arith.constant 1 : i32
      %211 = arith.addi %210, %c1_i32_90 : i32
      %212 = arith.index_cast %211 : i32 to index
      %c0_91 = arith.constant 0 : index
      %c0_92 = arith.constant 0 : index
      %213 = vector.load %arg9[%212, %c0_91, %c0_92] : memref<33x8x8xf32, #tpu.memory_space<vmem>>, vector<1x8x8xf32>
      %214 = vector.shape_cast %213 : vector<1x8x8xf32> to vector<8x8xf32>
      %215 = arith.mulf %203, %214 : vector<8x8xf32>
      %cst_93 = arith.constant dense<0.000000e+00> : vector<8xf32>
      %216 = vector.multi_reduction <add>, %215, %cst_93 [1] : vector<8x8xf32> to vector<8xf32>
      %217 = vector.shape_cast %216 : vector<8xf32> to vector<8x1xf32>
      %c1_i32_94 = arith.constant 1 : i32
      %218 = arith.addi %210, %c1_i32_94 : i32
      %219 = arith.index_cast %218 : i32 to index
      %220 = memref.load %arg10[%219] : memref<33xf32, #tpu.memory_space<smem>>
      %221 = vector.broadcast %220 : f32 to vector<8x1xf32>
      %222 = arith.addf %217, %221 : vector<8x1xf32>
      %223 = math.tanh %197 : vector<8x1xf32>
      %224 = arith.index_cast %210 : i32 to index
      %225 = memref.load %arg11[%224] : memref<32xf32, #tpu.memory_space<smem>>
      %226 = vector.broadcast %225 : f32 to vector<8x1xf32>
      %227 = arith.mulf %226, %223 : vector<8x1xf32>
      %228 = arith.addf %222, %227 : vector<8x1xf32>
      %229 = arith.index_cast %210 : i32 to index
      %c0_95 = arith.constant 0 : index
      %c0_96 = arith.constant 0 : index
      %230 = vector.load %arg8[%229, %c0_95, %c0_96] : memref<32x8x8xf32, #tpu.memory_space<vmem>>, vector<1x8x8xf32>
      %231 = vector.shape_cast %230 : vector<1x8x8xf32> to vector<8x8xf32>
      %232 = vector.broadcast %223 : vector<8x1xf32> to vector<8x8xf32>
      %233 = arith.mulf %231, %232 : vector<8x8xf32>
      %234 = arith.addf %203, %233 : vector<8x8xf32>
      %235 = vector.broadcast %210 : i32 to vector<8x32xi32>
      %236 = arith.cmpi eq, %36, %235 : vector<8x32xi32>
      %237 = vector.shape_cast %223 : vector<8x1xf32> to vector<8x1xf32>
      %238 = vector.broadcast %237 : vector<8x1xf32> to vector<8x32xf32>
      %239 = arith.select %236, %238, %208 : vector<8x32xi1>, vector<8x32xf32>
      scf.yield %234, %228, %239 : vector<8x8xf32>, vector<8x1xf32>, vector<8x32xf32>
    }
    %c8_i32_28 = arith.constant 8 : i32
    %48 = arith.mulf %47#2, %47#2 : vector<8x32xf32>
    %cst_29 = arith.constant 1.000000e+00 : f32
    %49 = vector.broadcast %cst_29 : f32 to vector<8x32xf32>
    %50 = arith.subf %49, %48 : vector<8x32xf32>
    %c0_30 = arith.constant 0 : index
    %c0_31 = arith.constant 0 : index
    %51 = vector.load %arg12[%c0_30, %c0_31] : memref<1x32xf32, #tpu.memory_space<vmem>>, vector<1x32xf32>
    %52 = vector.broadcast %51 : vector<1x32xf32> to vector<8x32xf32>
    %53 = arith.mulf %50, %52 : vector<8x32xf32>
    %cst_32 = arith.constant 1.000000e+00 : f32
    %54 = vector.broadcast %cst_32 : f32 to vector<8x32xf32>
    %55 = arith.addf %54, %53 : vector<8x32xf32>
    %56 = math.absf %55 : vector<8x32xf32>
    %57 = math.log %56 : vector<8x32xf32>
    %58 = vector.shape_cast %57 : vector<8x32xf32> to vector<1x8x32xf32>
    %cst_33 = arith.constant dense<0.000000e+00> : vector<1xf32>
    %59 = vector.multi_reduction <add>, %58, %cst_33 [1, 2] : vector<1x8x32xf32> to vector<1xf32>
    %60 = vector.shape_cast %59 : vector<1xf32> to vector<1x1x1xf32>
    %61 = vector.extract %60[0, 0, 0] : f32 from vector<1x1x1xf32>
    %cst_34 = arith.constant 1.000000e+00 : f32
    %62 = vector.broadcast %cst_34 : f32 to vector<8x8xf32>
    %63 = arith.addf %62, %28 : vector<8x8xf32>
    %64 = arith.mulf %29, %29 : vector<8x8xf32>
    %65 = arith.subf %63, %64 : vector<8x8xf32>
    %66 = math.exp %28 : vector<8x8xf32>
    %67 = arith.subf %65, %66 : vector<8x8xf32>
    %68 = vector.shape_cast %67 : vector<8x8xf32> to vector<1x8x8xf32>
    %cst_35 = arith.constant dense<0.000000e+00> : vector<1xf32>
    %69 = vector.multi_reduction <add>, %68, %cst_35 [1, 2] : vector<1x8x8xf32> to vector<1xf32>
    %70 = vector.shape_cast %69 : vector<1xf32> to vector<1x1x1xf32>
    %71 = vector.extract %70[0, 0, 0] : f32 from vector<1x1x1xf32>
    %cst_36 = arith.constant -5.000000e-01 : f32
    %72 = arith.mulf %cst_36, %71 : f32
    %73 = arith.subf %72, %61 : f32
    %c0_37 = arith.constant 0 : index
    %c0_38 = arith.constant 0 : index
    %74 = vector.load %arg13[%c0_37, %c0_38] : memref<8x256xf32, #tpu.memory_space<vmem>>, vector<8x256xf32>
    %cst_39 = arith.constant dense<0.000000e+00> : vector<8x256xf32>
    %75 = tpu.matmul %47#0, %74, %cst_39 {dimension_numbers = #tpu.dot_dimension_numbers<[1], [0], [0], [1], [0, 0, 1, 1], [], []>} : vector<8x8xf32>, vector<8x256xf32>, vector<8x256xf32> -> vector<8x256xf32>
    %c0_40 = arith.constant 0 : index
    %c0_41 = arith.constant 0 : index
    %76 = vector.load %arg14[%c0_40, %c0_41] : memref<1x256xf32, #tpu.memory_space<vmem>>, vector<1x256xf32>
    %77 = vector.broadcast %76 : vector<1x256xf32> to vector<8x256xf32>
    %78 = arith.addf %75, %77 : vector<8x256xf32>
    %cst_42 = arith.constant 0.000000e+00 : f32
    %79 = vector.broadcast %cst_42 : f32 to vector<8x256xf32>
    %80 = arith.maximumf %78, %79 : vector<8x256xf32>
    %c0_i32_43 = arith.constant 0 : i32
    %81 = tpu.memref_slice %arg24[%c0_i32_43] : memref<4x!tpu.dma_semaphore, #tpu.memory_space<semaphore_mem>> -> memref<1x!tpu.dma_semaphore, #tpu.memory_space<semaphore_mem>>
    %82 = tpu.memref_squeeze %81 : memref<1x!tpu.dma_semaphore, #tpu.memory_space<semaphore_mem>> -> memref<!tpu.dma_semaphore, #tpu.memory_space<semaphore_mem>>
    tpu.wait_dma2 semaphore(%82 : memref<!tpu.dma_semaphore, #tpu.memory_space<semaphore_mem>>) src(%arg15 : memref<256x512xf32, #tpu.memory_space<any>>) dst(%arg20 : memref<256x512xf32, #tpu.memory_space<vmem>>)
    %c2_i32_44 = arith.constant 2 : i32
    %83 = tpu.memref_slice %arg24[%c2_i32_44] : memref<4x!tpu.dma_semaphore, #tpu.memory_space<semaphore_mem>> -> memref<1x!tpu.dma_semaphore, #tpu.memory_space<semaphore_mem>>
    %84 = tpu.memref_squeeze %83 : memref<1x!tpu.dma_semaphore, #tpu.memory_space<semaphore_mem>> -> memref<!tpu.dma_semaphore, #tpu.memory_space<semaphore_mem>>
    tpu.wait_dma2 semaphore(%84 : memref<!tpu.dma_semaphore, #tpu.memory_space<semaphore_mem>>) src(%arg16 : memref<1x512xf32, #tpu.memory_space<any>>) dst(%arg21 : memref<1x512xf32, #tpu.memory_space<vmem>>)
    %c0_45 = arith.constant 0 : index
    %c0_46 = arith.constant 0 : index
    %85 = vector.load %arg20[%c0_45, %c0_46] : memref<256x512xf32, #tpu.memory_space<vmem>>, vector<256x512xf32>
    %cst_47 = arith.constant dense<0.000000e+00> : vector<8x512xf32>
    %86 = tpu.matmul %80, %85, %cst_47 {dimension_numbers = #tpu.dot_dimension_numbers<[1], [0], [0], [1], [0, 0, 1, 1], [], []>} : vector<8x256xf32>, vector<256x512xf32>, vector<8x512xf32> -> vector<8x512xf32>
    %c0_48 = arith.constant 0 : index
    %c0_49 = arith.constant 0 : index
    %87 = vector.load %arg21[%c0_48, %c0_49] : memref<1x512xf32, #tpu.memory_space<vmem>>, vector<1x512xf32>
    %88 = vector.broadcast %87 : vector<1x512xf32> to vector<8x512xf32>
    %89 = arith.addf %86, %88 : vector<8x512xf32>
    %cst_50 = arith.constant 0.000000e+00 : f32
    %90 = vector.broadcast %cst_50 : f32 to vector<8x512xf32>
    %91 = arith.maximumf %89, %90 : vector<8x512xf32>
    %c1_i32_51 = arith.constant 1 : i32
    %92 = tpu.memref_slice %arg24[%c1_i32_51] : memref<4x!tpu.dma_semaphore, #tpu.memory_space<semaphore_mem>> -> memref<1x!tpu.dma_semaphore, #tpu.memory_space<semaphore_mem>>
    %93 = tpu.memref_squeeze %92 : memref<1x!tpu.dma_semaphore, #tpu.memory_space<semaphore_mem>> -> memref<!tpu.dma_semaphore, #tpu.memory_space<semaphore_mem>>
    tpu.wait_dma2 semaphore(%93 : memref<!tpu.dma_semaphore, #tpu.memory_space<semaphore_mem>>) src(%arg17 : memref<512x128xf32, #tpu.memory_space<any>>) dst(%arg22 : memref<512x128xf32, #tpu.memory_space<vmem>>)
    %c3_i32_52 = arith.constant 3 : i32
    %94 = tpu.memref_slice %arg24[%c3_i32_52] : memref<4x!tpu.dma_semaphore, #tpu.memory_space<semaphore_mem>> -> memref<1x!tpu.dma_semaphore, #tpu.memory_space<semaphore_mem>>
    %95 = tpu.memref_squeeze %94 : memref<1x!tpu.dma_semaphore, #tpu.memory_space<semaphore_mem>> -> memref<!tpu.dma_semaphore, #tpu.memory_space<semaphore_mem>>
    tpu.wait_dma2 semaphore(%95 : memref<!tpu.dma_semaphore, #tpu.memory_space<semaphore_mem>>) src(%arg18 : memref<1x128xf32, #tpu.memory_space<any>>) dst(%arg23 : memref<1x128xf32, #tpu.memory_space<vmem>>)
    %c0_53 = arith.constant 0 : index
    %c0_54 = arith.constant 0 : index
    %96 = vector.load %arg22[%c0_53, %c0_54] : memref<512x128xf32, #tpu.memory_space<vmem>>, vector<512x128xf32>
    %cst_55 = arith.constant dense<0.000000e+00> : vector<8x128xf32>
    %97 = tpu.matmul %91, %96, %cst_55 {dimension_numbers = #tpu.dot_dimension_numbers<[1], [0], [0], [1], [0, 0, 1, 1], [], []>} : vector<8x512xf32>, vector<512x128xf32>, vector<8x128xf32> -> vector<8x128xf32>
    %c0_56 = arith.constant 0 : index
    %c0_57 = arith.constant 0 : index
    %98 = vector.load %arg23[%c0_56, %c0_57] : memref<1x128xf32, #tpu.memory_space<vmem>>, vector<1x128xf32>
    %99 = vector.broadcast %98 : vector<1x128xf32> to vector<8x128xf32>
    %100 = arith.addf %97, %99 : vector<8x128xf32>
    %101 = arith.negf %100 : vector<8x128xf32>
    %102 = math.exp %101 : vector<8x128xf32>
    %cst_58 = arith.constant 1.000000e+00 : f32
    %103 = vector.broadcast %cst_58 : f32 to vector<8x128xf32>
    %104 = arith.addf %103, %102 : vector<8x128xf32>
    %105 = arith.divf %103, %104 : vector<8x128xf32>
    %106 = tpu.iota {dimensions = array<i32: 0>} : vector<8x128xi32>
    %107 = tpu.iota {dimensions = array<i32: 1>} : vector<8x128xi32>
    %c0_i32_59 = arith.constant 0 : i32
    %108 = vector.broadcast %c0_i32_59 : i32 to vector<8x128xi32>
    %109 = arith.cmpi eq, %106, %108 : vector<8x128xi32>
    %c64_i32 = arith.constant 64 : i32
    %110 = vector.broadcast %c64_i32 : i32 to vector<8x128xi32>
    %111 = arith.cmpi eq, %107, %110 : vector<8x128xi32>
    %112 = arith.andi %109, %111 : vector<8x128xi1>
    %113 = vector.broadcast %73 : f32 to vector<8x128xf32>
    %114 = arith.select %112, %113, %105 : vector<8x128xi1>, vector<8x128xf32>
    %c0_60 = arith.constant 0 : index
    %c0_61 = arith.constant 0 : index
    %115 = vector.load %arg19[%c0_60, %c0_61] : memref<8x128xf32, #tpu.memory_space<vmem>>, vector<8x128xf32>
    tpu.vector_store %arg19[%c0_60, %c0_61], %114 {strides = array<i32>} : memref<8x128xf32, #tpu.memory_space<vmem>>, vector<8x128xf32>,
    return
  }
}

</mosaic_0001>

<bundles_post_ra>
// kernel: vae_nf_forward.1
= control target key start
LH: loop header
LB: loop body
LE: loop exit
PB: predicated region body
PF: predicated region fallthrough
CT: control target
= control target key end

     0   :  { %s3942_s0 = inlined_call_operand.vmem [shape: f32[8,64], index: 0, kind: input, shape index: {}]   ;;  %s3943_s1 = inlined_call_operand.vmem [shape: f32[8,8], index: 1, kind: input, shape index: {}]   ;;  %s3944_s2 = inlined_call_operand.vmem [shape: f32[64,512], index: 2, kind: input, shape index: {}]   ;;  %s3945_s3 = inlined_call_operand.vmem [shape: f32[1,512], index: 3, kind: input, shape index: {}]   ;;  %s3946_s4 = inlined_call_operand.vmem [shape: f32[512,256], index: 4, kind: input, shape index: {}]   ;;  %s3947_s5 = inlined_call_operand.vmem [shape: f32[1,256], index: 5, kind: input, shape index: {}]   ;;  %s3948_s6 = inlined_call_operand.vmem [shape: f32[256,16], index: 6, kind: input, shape index: {}]   ;;  %s3949_s7 = inlined_call_operand.vmem [shape: f32[1,16], index: 7, kind: input, shape index: {}]   ;;  %s3950_s8 = inlined_call_operand.vmem [shape: f32[32,8,8], index: 8, kind: input, shape index: {}]   ;;  %s3951_s9 = inlined_call_operand.vmem [shape: f32[33,8,8], index: 9, kind: input, shape index: {}]   ;;  %s3952_s10 = inlined_call_operand.vmem [shape: f32[33], index: 10, kind: input, shape index: {}]   ;;  %s3953_s11 = inlined_call_operand.vmem [shape: f32[32], index: 11, kind: input, shape index: {}]   ;;  %s3954_s12 = inlined_call_operand.vmem [shape: f32[1,32], index: 12, kind: input, shape index: {}]   ;;  %s3955_s13 = inlined_call_operand.vmem [shape: f32[8,256], index: 13, kind: input, shape index: {}]   ;;  %s3956_s14 = inlined_call_operand.vmem [shape: f32[1,256], index: 14, kind: input, shape index: {}]   ;;  %s3957_s15 = inlined_call_operand.vmem [shape: f32[256,512], index: 15, kind: input, shape index: {}]   ;;  %s3958_s16 = inlined_call_operand.vmem [shape: f32[1,512], index: 16, kind: input, shape index: {}]   ;;  %s3959_s17 = inlined_call_operand.vmem [shape: f32[512,128], index: 17, kind: input, shape index: {}]   ;;  %s3960_s18 = inlined_call_operand.vmem [shape: f32[1,128], index: 18, kind: input, shape index: {}]   ;;  %s3961_s19 = inlined_call_operand.vmem [shape: f32[8,128], index: 19, kind: output, shape index: {}]  }
   0x1   :  { %3963 = sst [smem:[#allocation21_spill]] %s3942_s0 }
   0x2   :  { %3964 = sst [smem:[#allocation22_spill]] %s3943_s1 }
   0x3   :  { %3965 = sst [smem:[#allocation23_spill]] %s3944_s2 }
   0x4   :  { %3966 = sst [smem:[#allocation24_spill]] %s3945_s3 }
   0x5   :  { %24 = vsyncpa [#allocation8], 0  ;;  %s52_s20 = sshll.u32 %s3952_s10, 4  ;;  %s53_s20 = int_to_ptr.vmem [resolvable:$true] %s52_s20 }
   0x6   :  { %25 = vsyncpa [#allocation10], 0  ;;  %s62_s22 = sshll.u32 %s3953_s11, 4  ;;  %s2412_s2 = scalar_lea.vmem %s53_s20, 16  ;;  %s63_s22 = int_to_ptr.vmem [resolvable:$true] %s62_s22 }
   0x7   :  { %p2413_p0 = scmp.ne.s32.totalorder %s53_s20, %s2412_s2  ;;  %p2417_p1 = scmp.lt.s32.totalorder %s53_s20, %s53_s20 }
   0x8   :  { %p2418_p2 = scmp.lt.s32.totalorder %s2412_s2, %s2412_s2 }
   0xa   :  { %p2419_p3 = por %p2418_p2, %p2417_p1 }
   0xc   :  { %p2420_p4 = pnand %p2419_p3, %p2413_p0 }
   0xe   :  { %2423 = shalt.err (!%p2420_p4)
}
   0xf   :  { %s2480_s23 = smov [#allocation7]   ;;  %s2424_s24 = scalar_lea.vmem %s63_s22, 16 }
  0x10   :  { %55 = dma.vmem_to_smem %s53_s20, 16, %s2480_s23, [#allocation8]  }
  0x11   :  { %p2425_p5 = scmp.ne.s32.totalorder %s63_s22, %s2424_s24  ;;  %p2429_p6 = scmp.lt.s32.totalorder %s63_s22, %s63_s22 }
  0x12   :  { %p2430_p7 = scmp.lt.s32.totalorder %s2424_s24, %s2424_s24 }
  0x14   :  { %p2431_p8 = por %p2430_p7, %p2429_p6 }
  0x16   :  { %p2432_p9 = pnand %p2431_p8, %p2425_p5 }
  0x18   :  { %2435 = shalt.err (!%p2432_p9)
}
  0x19   :  { %s2481_s10 = smov [#allocation9]  }
  0x1a   :  { %65 = dma.vmem_to_smem %s63_s22, 16, %s2481_s10, [#allocation10]  }
  0x1b   :  { %2452 = dma.done.wait [#allocation8], 16  }
  0x1c   :  { %2453 = vsyncadd [#allocation8], 4294967280 }
  0x1d   :  { %2454 = dma.done.wait [#allocation10], 16  }
  0x1e   :  { %2455 = vsyncadd [#allocation10], 4294967280 }
  0x1f   :  { %78 = sfence }
  0x20   :  { %v112_v0 = vld [vmem:[%s3957_s15] sm:$0xff]  ;;  %v114_v1 = vld [vmem:[%s3957_s15 + $0x8] sm:$0xff]  ;;  %v116_v2 = vld [vmem:[%s3957_s15 + $0x10] sm:$0xff] }
  0x21   :  { %113 = vst [vmem:[#allocation2 + $0x2b0] sm:$0xff] %v112_v0  ;;  %115 = vst [vmem:[#allocation2 + $0x3b0] sm:$0xff] %v114_v1  ;;  %v118_v3 = vld [vmem:[%s3957_s15 + $0x18] sm:$0xff]  ;;  %v120_v4 = vld [vmem:[%s3957_s15 + $0x20] sm:$0xff] }
  0x22   :  { %117 = vst [vmem:[#allocation2 + $0xd8] sm:$0xff] %v116_v2  ;;  %v122_v5 = vld [vmem:[%s3957_s15 + $0x28] sm:$0xff]  ;;  %119 = vst [vmem:[#allocation2 + $0x18] sm:$0xff] %v118_v3  ;;  %v124_v6 = vld [vmem:[%s3957_s15 + $0x30] sm:$0xff] }
  0x23   :  { %121 = vst [vmem:[#allocation2 + $0x50] sm:$0xff] %v120_v4  ;;  %123 = vst [vmem:[#allocation2 + $0x368] sm:$0xff] %v122_v5  ;;  %v126_v7 = vld [vmem:[%s3957_s15 + $0x38] sm:$0xff]  ;;  %v128_v8 = vld [vmem:[%s3957_s15 + $0x40] sm:$0xff] }
  0x24   :  { %125 = vst [vmem:[#allocation2 + $0x330] sm:$0xff] %v124_v6  ;;  %127 = vst [vmem:[#allocation2 + $0x48] sm:$0xff] %v126_v7  ;;  %v130_v9 = vld [vmem:[%s3957_s15 + $0x48] sm:$0xff]  ;;  %v132_v10 = vld [vmem:[%s3957_s15 + $0x50] sm:$0xff] }
  0x25   :  { %129 = vst [vmem:[#allocation2 + $0x380] sm:$0xff] %v128_v8  ;;  %v134_v11 = vld [vmem:[%s3957_s15 + $0x58] sm:$0xff]  ;;  %131 = vst [vmem:[#allocation2 + $0x110] sm:$0xff] %v130_v9  ;;  %v136_v12 = vld [vmem:[%s3957_s15 + $0x60] sm:$0xff] }
  0x26   :  { %133 = vst [vmem:[#allocation2 + $0x118] sm:$0xff] %v132_v10  ;;  %135 = vst [vmem:[#allocation2 + $0x98] sm:$0xff] %v134_v11  ;;  %v138_v13 = vld [vmem:[%s3957_s15 + $0x68] sm:$0xff]  ;;  %v140_v14 = vld [vmem:[%s3957_s15 + $0x70] sm:$0xff] }
  0x27   :  { %137 = vst [vmem:[#allocation2 + $0x320] sm:$0xff] %v136_v12  ;;  %139 = vst [vmem:[#allocation2 + $0x150] sm:$0xff] %v138_v13  ;;  %v142_v15 = vld [vmem:[%s3957_s15 + $0x78] sm:$0xff]  ;;  %v144_v16 = vld [vmem:[%s3957_s15 + $0x80] sm:$0xff] }
  0x28   :  { %141 = vst [vmem:[#allocation2 + $0x108] sm:$0xff] %v140_v14  ;;  %v146_v17 = vld [vmem:[%s3957_s15 + $0x88] sm:$0xff]  ;;  %143 = vst [vmem:[#allocation2 + $0x60] sm:$0xff] %v142_v15  ;;  %v148_v18 = vld [vmem:[%s3957_s15 + $0x90] sm:$0xff] }
  0x29   :  { %145 = vst [vmem:[#allocation2 + $0x2e0] sm:$0xff] %v144_v16  ;;  %147 = vst [vmem:[#allocation2 + $0x388] sm:$0xff] %v146_v17  ;;  %v150_v19 = vld [vmem:[%s3957_s15 + $0x98] sm:$0xff]  ;;  %v152_v20 = vld [vmem:[%s3957_s15 + $0xa0] sm:$0xff] }
  0x2a   :  { %149 = vst [vmem:[#allocation2 + $0x338] sm:$0xff] %v148_v18  ;;  %151 = vst [vmem:[#allocation2 + $0x340] sm:$0xff] %v150_v19  ;;  %v154_v21 = vld [vmem:[%s3957_s15 + $0xa8] sm:$0xff]  ;;  %v156_v22 = vld [vmem:[%s3957_s15 + $0xb0] sm:$0xff] }
  0x2b   :  { %153 = vst [vmem:[#allocation2 + $0x80] sm:$0xff] %v152_v20  ;;  %v158_v23 = vld [vmem:[%s3957_s15 + $0xb8] sm:$0xff]  ;;  %155 = vst [vmem:[#allocation2 + $0x1a8] sm:$0xff] %v154_v21  ;;  %v160_v24 = vld [vmem:[%s3957_s15 + $0xc0] sm:$0xff] }
  0x2c   :  { %157 = vst [vmem:[#allocation2 + $0x1b8] sm:$0xff] %v156_v22  ;;  %159 = vst [vmem:[#allocation2 + $0x168] sm:$0xff] %v158_v23  ;;  %v162_v25 = vld [vmem:[%s3957_s15 + $0xc8] sm:$0xff]  ;;  %v164_v26 = vld [vmem:[%s3957_s15 + $0xd0] sm:$0xff] }
  0x2d   :  { %161 = vst [vmem:[#allocation2 + $0x3e8] sm:$0xff] %v160_v24  ;;  %163 = vst [vmem:[#allocation2 + $0x2f8] sm:$0xff] %v162_v25  ;;  %v166_v27 = vld [vmem:[%s3957_s15 + $0xd8] sm:$0xff]  ;;  %v168_v28 = vld [vmem:[%s3957_s15 + $0xe0] sm:$0xff] }
  0x2e   :  { %165 = vst [vmem:[#allocation2 + $0x290] sm:$0xff] %v164_v26  ;;  %v170_v29 = vld [vmem:[%s3957_s15 + $0xe8] sm:$0xff]  ;;  %167 = vst [vmem:[#allocation2 + $0x28] sm:$0xff] %v166_v27  ;;  %v172_v30 = vld [vmem:[%s3957_s15 + $0xf0] sm:$0xff] }
  0x2f   :  { %169 = vst [vmem:[#allocation2 + $0x138] sm:$0xff] %v168_v28  ;;  %171 = vst [vmem:[#allocation2 + $0xc0] sm:$0xff] %v170_v29  ;;  %v174_v31 = vld [vmem:[%s3957_s15 + $0xf8] sm:$0xff]  ;;  %v176_v32 = vld [vmem:[%s3957_s15 + $0x100] sm:$0xff] }
  0x30   :  { %173 = vst [vmem:[#allocation2 + $0x1c0] sm:$0xff] %v172_v30  ;;  %175 = vst [vmem:[#allocation2 + $0x280] sm:$0xff] %v174_v31  ;;  %v178_v33 = vld [vmem:[%s3957_s15 + $0x108] sm:$0xff]  ;;  %v180_v34 = vld [vmem:[%s3957_s15 + $0x110] sm:$0xff] }
  0x31   :  { %177 = vst [vmem:[#allocation2 + $0x100] sm:$0xff] %v176_v32  ;;  %v182_v35 = vld [vmem:[%s3957_s15 + $0x118] sm:$0xff]  ;;  %179 = vst [vmem:[#allocation2 + $0x3c0] sm:$0xff] %v178_v33  ;;  %v184_v36 = vld [vmem:[%s3957_s15 + $0x120] sm:$0xff] }
  0x32   :  { %181 = vst [vmem:[#allocation2 + $0x158] sm:$0xff] %v180_v34  ;;  %183 = vst [vmem:[#allocation2 + $0x3e0] sm:$0xff] %v182_v35  ;;  %v186_v37 = vld [vmem:[%s3957_s15 + $0x128] sm:$0xff]  ;;  %v188_v38 = vld [vmem:[%s3957_s15 + $0x130] sm:$0xff] }
  0x33   :  { %185 = vst [vmem:[#allocation2 + $0x218] sm:$0xff] %v184_v36  ;;  %187 = vst [vmem:[#allocation2 + $0x3f8] sm:$0xff] %v186_v37  ;;  %v190_v39 = vld [vmem:[%s3957_s15 + $0x138] sm:$0xff]  ;;  %v192_v40 = vld [vmem:[%s3957_s15 + $0x140] sm:$0xff] }
  0x34   :  { %189 = vst [vmem:[#allocation2 + $0x8] sm:$0xff] %v188_v38  ;;  %v194_v41 = vld [vmem:[%s3957_s15 + $0x148] sm:$0xff]  ;;  %191 = vst [vmem:[#allocation2 + $0x128] sm:$0xff] %v190_v39  ;;  %v196_v42 = vld [vmem:[%s3957_s15 + $0x150] sm:$0xff] }
  0x35   :  { %193 = vst [vmem:[#allocation2 + $0x2a0] sm:$0xff] %v192_v40  ;;  %195 = vst [vmem:[#allocation2 + $0x3f0] sm:$0xff] %v194_v41  ;;  %v198_v43 = vld [vmem:[%s3957_s15 + $0x158] sm:$0xff]  ;;  %v200_v44 = vld [vmem:[%s3957_s15 + $0x160] sm:$0xff] }
  0x36   :  { %197 = vst [vmem:[#allocation2 + $0xa0] sm:$0xff] %v196_v42  ;;  %199 = vst [vmem:[#allocation2 + $0x2c0] sm:$0xff] %v198_v43  ;;  %v202_v45 = vld [vmem:[%s3957_s15 + $0x168] sm:$0xff]  ;;  %v204_v46 = vld [vmem:[%s3957_s15 + $0x170] sm:$0xff] }
  0x37   :  { %201 = vst [vmem:[#allocation2 + $0xb0] sm:$0xff] %v200_v44  ;;  %v206_v47 = vld [vmem:[%s3957_s15 + $0x178] sm:$0xff]  ;;  %203 = vst [vmem:[#allocation2 + $0x1e0] sm:$0xff] %v202_v45  ;;  %v208_v48 = vld [vmem:[%s3957_s15 + $0x180] sm:$0xff] }
  0x38   :  { %205 = vst [vmem:[#allocation2 + $0x1f0] sm:$0xff] %v204_v46  ;;  %207 = vst [vmem:[#allocation2 + $0x10] sm:$0xff] %v206_v47  ;;  %v210_v49 = vld [vmem:[%s3957_s15 + $0x188] sm:$0xff]  ;;  %v212_v50 = vld [vmem:[%s3957_s15 + $0x190] sm:$0xff] }
  0x39   :  { %209 = vst [vmem:[#allocation2 + $0x230] sm:$0xff] %v208_v48  ;;  %211 = vst [vmem:[#allocation2 + $0x240] sm:$0xff] %v210_v49  ;;  %v214_v51 = vld [vmem:[%s3957_s15 + $0x198] sm:$0xff]  ;;  %v216_v52 = vld [vmem:[%s3957_s15 + $0x1a0] sm:$0xff] }
  0x3a   :  { %213 = vst [vmem:[#allocation2 + $0x90] sm:$0xff] %v212_v50  ;;  %v218_v53 = vld [vmem:[%s3957_s15 + $0x1a8] sm:$0xff]  ;;  %215 = vst [vmem:[#allocation2 + $0x3a0] sm:$0xff] %v214_v51  ;;  %v220_v54 = vld [vmem:[%s3957_s15 + $0x1b0] sm:$0xff] }
  0x3b   :  { %217 = vst [vmem:[#allocation2 + $0x208] sm:$0xff] %v216_v52  ;;  %219 = vst [vmem:[#allocation2 + $0xd0] sm:$0xff] %v218_v53  ;;  %v222_v55 = vld [vmem:[%s3957_s15 + $0x1b8] sm:$0xff]  ;;  %v224_v56 = vld [vmem:[%s3957_s15 + $0x1c0] sm:$0xff] }
  0x3c   :  { %221 = vst [vmem:[#allocation2 + $0x88] sm:$0xff] %v220_v54  ;;  %223 = vst [vmem:[#allocation2 + $0x2f0] sm:$0xff] %v222_v55  ;;  %v226_v57 = vld [vmem:[%s3957_s15 + $0x1c8] sm:$0xff]  ;;  %v228_v58 = vld [vmem:[%s3957_s15 + $0x1d0] sm:$0xff] }
  0x3d   :  { %225 = vst [vmem:[#allocation2 + $0x358] sm:$0xff] %v224_v56  ;;  %v230_v59 = vld [vmem:[%s3957_s15 + $0x1d8] sm:$0xff]  ;;  %227 = vst [vmem:[#allocation2 + $0x268] sm:$0xff] %v226_v57  ;;  %v232_v60 = vld [vmem:[%s3957_s15 + $0x1e0] sm:$0xff] }
  0x3e   :  { %229 = vst [vmem:[#allocation2 + $0x350] sm:$0xff] %v228_v58  ;;  %231 = vst [vmem:[#allocation2 + $0x188] sm:$0xff] %v230_v59  ;;  %v234_v61 = vld [vmem:[%s3957_s15 + $0x1e8] sm:$0xff]  ;;  %v236_v62 = vld [vmem:[%s3957_s15 + $0x1f0] sm:$0xff] }
  0x3f   :  { %233 = vst [vmem:[#allocation2 + $0x1d8] sm:$0xff] %v232_v60  ;;  %235 = vst [vmem:[#allocation2 + $0x30] sm:$0xff] %v234_v61  ;;  %v238_v63 = vld [vmem:[%s3957_s15 + $0x1f8] sm:$0xff]  ;;  %v240_v0 = vld [vmem:[%s3957_s15 + $0x200] sm:$0xff] }
  0x40   :  { %237 = vst [vmem:[#allocation2 + $0x140] sm:$0xff] %v236_v62  ;;  %v242_v1 = vld [vmem:[%s3957_s15 + $0x208] sm:$0xff]  ;;  %239 = vst [vmem:[#allocation2 + $0x2a8] sm:$0xff] %v238_v63  ;;  %v244_v2 = vld [vmem:[%s3957_s15 + $0x210] sm:$0xff] }
  0x41   :  { %241 = vst [vmem:[#allocation2 + $0x130] sm:$0xff] %v240_v0  ;;  %243 = vst [vmem:[#allocation2 + $0x200] sm:$0xff] %v242_v1  ;;  %v246_v3 = vld [vmem:[%s3957_s15 + $0x218] sm:$0xff]  ;;  %v248_v4 = vld [vmem:[%s3957_s15 + $0x220] sm:$0xff] }
  0x42   :  { %245 = vst [vmem:[#allocation2 + $0x318] sm:$0xff] %v244_v2  ;;  %247 = vst [vmem:[#allocation2 + $0x220] sm:$0xff] %v246_v3  ;;  %v250_v5 = vld [vmem:[%s3957_s15 + $0x228] sm:$0xff]  ;;  %v252_v6 = vld [vmem:[%s3957_s15 + $0x230] sm:$0xff] }
  0x43   :  { %249 = vst [vmem:[#allocation2 + $0x70] sm:$0xff] %v248_v4  ;;  %v254_v7 = vld [vmem:[%s3957_s15 + $0x238] sm:$0xff]  ;;  %251 = vst [vmem:[#allocation2 + $0x300] sm:$0xff] %v250_v5  ;;  %v256_v8 = vld [vmem:[%s3957_s15 + $0x240] sm:$0xff] }
  0x44   :  { %253 = vst [vmem:[#allocation2 + $0xe0] sm:$0xff] %v252_v6  ;;  %255 = vst [vmem:[#allocation2 + $0x178] sm:$0xff] %v254_v7  ;;  %v258_v9 = vld [vmem:[%s3957_s15 + $0x248] sm:$0xff]  ;;  %v260_v10 = vld [vmem:[%s3957_s15 + $0x250] sm:$0xff] }
  0x45   :  { %257 = vst [vmem:[#allocation2 + $0x328] sm:$0xff] %v256_v8  ;;  %259 = vst [vmem:[#allocation2 + $0x260] sm:$0xff] %v258_v9  ;;  %v262_v11 = vld [vmem:[%s3957_s15 + $0x258] sm:$0xff]  ;;  %v264_v12 = vld [vmem:[%s3957_s15 + $0x260] sm:$0xff] }
  0x46   :  { %261 = vst [vmem:[#allocation2 + $0x3b8] sm:$0xff] %v260_v10  ;;  %v266_v13 = vld [vmem:[%s3957_s15 + $0x268] sm:$0xff]  ;;  %263 = vst [vmem:[#allocation2 + $0x2b8] sm:$0xff] %v262_v11  ;;  %v268_v14 = vld [vmem:[%s3957_s15 + $0x270] sm:$0xff] }
  0x47   :  { %265 = vst [vmem:[#allocation2 + $0x248] sm:$0xff] %v264_v12  ;;  %267 = vst [vmem:[#allocation2 + $0x40] sm:$0xff] %v266_v13  ;;  %v270_v15 = vld [vmem:[%s3957_s15 + $0x278] sm:$0xff]  ;;  %v272_v16 = vld [vmem:[%s3957_s15 + $0x280] sm:$0xff] }
  0x48   :  { %269 = vst [vmem:[#allocation2 + $0x20] sm:$0xff] %v268_v14  ;;  %271 = vst [vmem:[#allocation2 + $0xe8] sm:$0xff] %v270_v15  ;;  %v274_v17 = vld [vmem:[%s3957_s15 + $0x288] sm:$0xff]  ;;  %v276_v18 = vld [vmem:[%s3957_s15 + $0x290] sm:$0xff] }
  0x49   :  { %273 = vst [vmem:[#allocation2 + $0x288] sm:$0xff] %v272_v16  ;;  %v278_v19 = vld [vmem:[%s3957_s15 + $0x298] sm:$0xff]  ;;  %275 = vst [vmem:[#allocation2 + $0x3a8] sm:$0xff] %v274_v17  ;;  %v280_v20 = vld [vmem:[%s3957_s15 + $0x2a0] sm:$0xff] }
  0x4a   :  { %277 = vst [vmem:[#allocation2 + $0x3c8] sm:$0xff] %v276_v18  ;;  %279 = vst [vmem:[#allocation2 + $0x160] sm:$0xff] %v278_v19  ;;  %v282_v21 = vld [vmem:[%s3957_s15 + $0x2a8] sm:$0xff]  ;;  %v284_v22 = vld [vmem:[%s3957_s15 + $0x2b0] sm:$0xff] }
  0x4b   :  { %281 = vst [vmem:[#allocation2 + $0x2c8] sm:$0xff] %v280_v20  ;;  %283 = vst [vmem:[#allocation2 + $0x210] sm:$0xff] %v282_v21  ;;  %v286_v23 = vld [vmem:[%s3957_s15 + $0x2b8] sm:$0xff]  ;;  %v288_v24 = vld [vmem:[%s3957_s15 + $0x2c0] sm:$0xff] }
  0x4c   :  { %285 = vst [vmem:[#allocation2 + $0x3d8] sm:$0xff] %v284_v22  ;;  %v290_v25 = vld [vmem:[%s3957_s15 + $0x2c8] sm:$0xff]  ;;  %287 = vst [vmem:[#allocation2 + $0x1e8] sm:$0xff] %v286_v23  ;;  %v292_v26 = vld [vmem:[%s3957_s15 + $0x2d0] sm:$0xff] }
  0x4d   :  { %289 = vst [vmem:[#allocation2 + $0x1b0] sm:$0xff] %v288_v24  ;;  %291 = vst [vmem:[#allocation2 + $0x1c8] sm:$0xff] %v290_v25  ;;  %v294_v27 = vld [vmem:[%s3957_s15 + $0x2d8] sm:$0xff]  ;;  %v296_v28 = vld [vmem:[%s3957_s15 + $0x2e0] sm:$0xff] }
  0x4e   :  { %293 = vst [vmem:[#allocation2 + $0x2d0] sm:$0xff] %v292_v26  ;;  %295 = vst [vmem:[#allocation2 + $0x1d0] sm:$0xff] %v294_v27  ;;  %v298_v29 = vld [vmem:[%s3957_s15 + $0x2e8] sm:$0xff]  ;;  %v300_v30 = vld [vmem:[%s3957_s15 + $0x2f0] sm:$0xff] }
  0x4f   :  { %297 = vst [vmem:[#allocation2 + $0x58] sm:$0xff] %v296_v28  ;;  %v302_v31 = vld [vmem:[%s3957_s15 + $0x2f8] sm:$0xff]  ;;  %299 = vst [vmem:[#allocation2 + $0x120] sm:$0xff] %v298_v29  ;;  %v304_v32 = vld [vmem:[%s3957_s15 + $0x300] sm:$0xff] }
  0x50   :  { %301 = vst [vmem:[#allocation2 + $0x198] sm:$0xff] %v300_v30  ;;  %303 = vst [vmem:[#allocation2 + $0x2e8] sm:$0xff] %v302_v31  ;;  %v306_v33 = vld [vmem:[%s3957_s15 + $0x308] sm:$0xff]  ;;  %v308_v34 = vld [vmem:[%s3957_s15 + $0x310] sm:$0xff] }
  0x51   :  { %305 = vst [vmem:[#allocation2 + $0x1f8] sm:$0xff] %v304_v32  ;;  %307 = vst [vmem:[#allocation2 + $0x238] sm:$0xff] %v306_v33  ;;  %v310_v35 = vld [vmem:[%s3957_s15 + $0x318] sm:$0xff]  ;;  %v312_v36 = vld [vmem:[%s3957_s15 + $0x320] sm:$0xff] }
  0x52   :  { %309 = vst [vmem:[#allocation2 + $0x398] sm:$0xff] %v308_v34  ;;  %v314_v37 = vld [vmem:[%s3957_s15 + $0x328] sm:$0xff]  ;;  %311 = vst [vmem:[#allocation2 + $0x390] sm:$0xff] %v310_v35  ;;  %v316_v38 = vld [vmem:[%s3957_s15 + $0x330] sm:$0xff] }
  0x53   :  { %313 = vst [vmem:[#allocation2 + $0x1a0] sm:$0xff] %v312_v36  ;;  %315 = vst [vmem:[#allocation2 + $0xa8] sm:$0xff] %v314_v37  ;;  %v318_v39 = vld [vmem:[%s3957_s15 + $0x338] sm:$0xff]  ;;  %v320_v40 = vld [vmem:[%s3957_s15 + $0x340] sm:$0xff] }
  0x54   :  { %317 = vst [vmem:[#allocation2 + $0x258] sm:$0xff] %v316_v38  ;;  %319 = vst [vmem:[#allocation2 + $0x2d8] sm:$0xff] %v318_v39  ;;  %v322_v41 = vld [vmem:[%s3957_s15 + $0x348] sm:$0xff]  ;;  %v324_v42 = vld [vmem:[%s3957_s15 + $0x350] sm:$0xff] }
  0x55   :  { %321 = vst [vmem:[#allocation2 + $0xf0] sm:$0xff] %v320_v40  ;;  %v326_v43 = vld [vmem:[%s3957_s15 + $0x358] sm:$0xff]  ;;  %323 = vst [vmem:[#allocation2 + $0x180] sm:$0xff] %v322_v41  ;;  %v328_v44 = vld [vmem:[%s3957_s15 + $0x360] sm:$0xff] }
  0x56   :  { %325 = vst [vmem:[#allocation2 + $0x170] sm:$0xff] %v324_v42  ;;  %327 = vst [vmem:[#allocation2 + $0x3d0] sm:$0xff] %v326_v43  ;;  %v330_v45 = vld [vmem:[%s3957_s15 + $0x368] sm:$0xff]  ;;  %v332_v46 = vld [vmem:[%s3957_s15 + $0x370] sm:$0xff] }
  0x57   :  { %329 = vst [vmem:[#allocation2 + $0x250] sm:$0xff] %v328_v44  ;;  %331 = vst [vmem:[#allocation2 + $0x378] sm:$0xff] %v330_v45  ;;  %v334_v47 = vld [vmem:[%s3957_s15 + $0x378] sm:$0xff]  ;;  %v336_v48 = vld [vmem:[%s3957_s15 + $0x380] sm:$0xff] }
  0x58   :  { %333 = vst [vmem:[#allocation2 + $0xb8] sm:$0xff] %v332_v46  ;;  %v338_v49 = vld [vmem:[%s3957_s15 + $0x388] sm:$0xff]  ;;  %335 = vst [vmem:[#allocation2 + $0x38] sm:$0xff] %v334_v47  ;;  %v340_v50 = vld [vmem:[%s3957_s15 + $0x390] sm:$0xff] }
  0x59   :  { %337 = vst [vmem:[#allocation2 + $0x78] sm:$0xff] %v336_v48  ;;  %339 = vst [vmem:[#allocation2 + $0x308] sm:$0xff] %v338_v49  ;;  %v342_v51 = vld [vmem:[%s3957_s15 + $0x398] sm:$0xff]  ;;  %v344_v52 = vld [vmem:[%s3957_s15 + $0x3a0] sm:$0xff] }
  0x5a   :  { %341 = vst [vmem:[#allocation2 + $0x370] sm:$0xff] %v340_v50  ;;  %343 = vst [vmem:[#allocation2 + $0xc8] sm:$0xff] %v342_v51  ;;  %v346_v53 = vld [vmem:[%s3957_s15 + $0x3a8] sm:$0xff]  ;;  %v348_v54 = vld [vmem:[%s3957_s15 + $0x3b0] sm:$0xff] }
  0x5b   :  { %345 = vst [vmem:[#allocation2 + $0x278] sm:$0xff] %v344_v52  ;;  %v350_v55 = vld [vmem:[%s3957_s15 + $0x3b8] sm:$0xff]  ;;  %347 = vst [vmem:[#allocation2 + $0x360] sm:$0xff] %v346_v53  ;;  %v352_v56 = vld [vmem:[%s3957_s15 + $0x3c0] sm:$0xff] }
  0x5c   :  { %349 = vst [vmem:[#allocation2 + $0x228] sm:$0xff] %v348_v54  ;;  %351 = vst [vmem:[#allocation2 + $0x348] sm:$0xff] %v350_v55  ;;  %v354_v57 = vld [vmem:[%s3957_s15 + $0x3c8] sm:$0xff]  ;;  %v356_v58 = vld [vmem:[%s3957_s15 + $0x3d0] sm:$0xff] }
  0x5d   :  { %353 = vst [vmem:[#allocation2 + $0x148] sm:$0xff] %v352_v56  ;;  %355 = vst [vmem:[#allocation2 + $0xf8] sm:$0xff] %v354_v57  ;;  %v358_v59 = vld [vmem:[%s3957_s15 + $0x3d8] sm:$0xff]  ;;  %v360_v60 = vld [vmem:[%s3957_s15 + $0x3e0] sm:$0xff] }
  0x5e   :  { %357 = vst [vmem:[#allocation2 + $0x68] sm:$0xff] %v356_v58  ;;  %v362_v61 = vld [vmem:[%s3957_s15 + $0x3e8] sm:$0xff]  ;;  %359 = vst [vmem:[#allocation2] sm:$0xff] %v358_v59  ;;  %v364_v62 = vld [vmem:[%s3957_s15 + $0x3f0] sm:$0xff] }
  0x5f   :  { %361 = vst [vmem:[#allocation2 + $0x298] sm:$0xff] %v360_v60  ;;  %363 = vst [vmem:[#allocation2 + $0x270] sm:$0xff] %v362_v61  ;;  %v366_v63 = vld [vmem:[%s3957_s15 + $0x3f8] sm:$0xff] }
  0x60   :  { %365 = vst [vmem:[#allocation2 + $0x310] sm:$0xff] %v364_v62  ;;  %367 = vst [vmem:[#allocation2 + $0x190] sm:$0xff] %v366_v63 }
  0x61   :  { %375 = vsyncadd [#allocation6], 16384  ;;  %v410_v0 = vld [vmem:[%s3959_s17] sm:$0xff]  ;;  %v412_v1 = vld [vmem:[%s3959_s17 + $0x8] sm:$0xff] }
  0x62   :  { %411 = vst [vmem:[#allocation4 + $0xf8] sm:$0xff] %v410_v0  ;;  %413 = vst [vmem:[#allocation4 + $0x130] sm:$0xff] %v412_v1  ;;  %v414_v2 = vld [vmem:[%s3959_s17 + $0x10] sm:$0xff]  ;;  %v416_v3 = vld [vmem:[%s3959_s17 + $0x18] sm:$0xff] }
  0x63   :  { %v418_v4 = vld [vmem:[%s3959_s17 + $0x20] sm:$0xff]  ;;  %415 = vst [vmem:[#allocation4 + $0x28] sm:$0xff] %v414_v2  ;;  %417 = vst [vmem:[#allocation4] sm:$0xff] %v416_v3  ;;  %v420_v5 = vld [vmem:[%s3959_s17 + $0x28] sm:$0xff] }
  0x64   :  { %419 = vst [vmem:[#allocation4 + $0x8] sm:$0xff] %v418_v4  ;;  %v422_v6 = vld [vmem:[%s3959_s17 + $0x30] sm:$0xff]  ;;  %v424_v7 = vld [vmem:[%s3959_s17 + $0x38] sm:$0xff]  ;;  %421 = vst [vmem:[#allocation4 + $0x78] sm:$0xff] %v420_v5 }
  0x65   :  { %423 = vst [vmem:[#allocation4 + $0x90] sm:$0xff] %v422_v6  ;;  %425 = vst [vmem:[#allocation4 + $0x20] sm:$0xff] %v424_v7  ;;  %v426_v8 = vld [vmem:[%s3959_s17 + $0x40] sm:$0xff]  ;;  %v428_v9 = vld [vmem:[%s3959_s17 + $0x48] sm:$0xff] }
  0x66   :  { %v430_v10 = vld [vmem:[%s3959_s17 + $0x50] sm:$0xff]  ;;  %427 = vst [vmem:[#allocation4 + $0x18] sm:$0xff] %v426_v8  ;;  %429 = vst [vmem:[#allocation4 + $0x1d0] sm:$0xff] %v428_v9  ;;  %v432_v11 = vld [vmem:[%s3959_s17 + $0x58] sm:$0xff] }
  0x67   :  { %431 = vst [vmem:[#allocation4 + $0x128] sm:$0xff] %v430_v10  ;;  %v434_v12 = vld [vmem:[%s3959_s17 + $0x60] sm:$0xff]  ;;  %v436_v13 = vld [vmem:[%s3959_s17 + $0x68] sm:$0xff]  ;;  %433 = vst [vmem:[#allocation4 + $0x70] sm:$0xff] %v432_v11 }
  0x68   :  { %435 = vst [vmem:[#allocation4 + $0x1e8] sm:$0xff] %v434_v12  ;;  %437 = vst [vmem:[#allocation4 + $0x40] sm:$0xff] %v436_v13  ;;  %v438_v14 = vld [vmem:[%s3959_s17 + $0x70] sm:$0xff]  ;;  %v440_v15 = vld [vmem:[%s3959_s17 + $0x78] sm:$0xff] }
  0x69   :  { %v442_v16 = vld [vmem:[%s3959_s17 + $0x80] sm:$0xff]  ;;  %439 = vst [vmem:[#allocation4 + $0x178] sm:$0xff] %v438_v14  ;;  %441 = vst [vmem:[#allocation4 + $0x138] sm:$0xff] %v440_v15  ;;  %v444_v17 = vld [vmem:[%s3959_s17 + $0x88] sm:$0xff] }
  0x6a   :  { %443 = vst [vmem:[#allocation4 + $0x100] sm:$0xff] %v442_v16  ;;  %v446_v18 = vld [vmem:[%s3959_s17 + $0x90] sm:$0xff]  ;;  %v448_v19 = vld [vmem:[%s3959_s17 + $0x98] sm:$0xff]  ;;  %445 = vst [vmem:[#allocation4 + $0x38] sm:$0xff] %v444_v17 }
  0x6b   :  { %447 = vst [vmem:[#allocation4 + $0xb8] sm:$0xff] %v446_v18  ;;  %449 = vst [vmem:[#allocation4 + $0x48] sm:$0xff] %v448_v19  ;;  %v450_v20 = vld [vmem:[%s3959_s17 + $0xa0] sm:$0xff]  ;;  %v452_v21 = vld [vmem:[%s3959_s17 + $0xa8] sm:$0xff] }
  0x6c   :  { %v454_v22 = vld [vmem:[%s3959_s17 + $0xb0] sm:$0xff]  ;;  %451 = vst [vmem:[#allocation4 + $0x10] sm:$0xff] %v450_v20  ;;  %453 = vst [vmem:[#allocation4 + $0x80] sm:$0xff] %v452_v21  ;;  %v456_v23 = vld [vmem:[%s3959_s17 + $0xb8] sm:$0xff] }
  0x6d   :  { %455 = vst [vmem:[#allocation4 + $0x118] sm:$0xff] %v454_v22  ;;  %v458_v24 = vld [vmem:[%s3959_s17 + $0xc0] sm:$0xff]  ;;  %v460_v25 = vld [vmem:[%s3959_s17 + $0xc8] sm:$0xff]  ;;  %457 = vst [vmem:[#allocation4 + $0xa0] sm:$0xff] %v456_v23 }
  0x6e   :  { %459 = vst [vmem:[#allocation4 + $0x30] sm:$0xff] %v458_v24  ;;  %461 = vst [vmem:[#allocation4 + $0x148] sm:$0xff] %v460_v25  ;;  %v462_v26 = vld [vmem:[%s3959_s17 + $0xd0] sm:$0xff]  ;;  %v464_v27 = vld [vmem:[%s3959_s17 + $0xd8] sm:$0xff] }
  0x6f   :  { %v466_v28 = vld [vmem:[%s3959_s17 + $0xe0] sm:$0xff]  ;;  %463 = vst [vmem:[#allocation4 + $0xa8] sm:$0xff] %v462_v26  ;;  %465 = vst [vmem:[#allocation4 + $0x1a8] sm:$0xff] %v464_v27  ;;  %v468_v29 = vld [vmem:[%s3959_s17 + $0xe8] sm:$0xff] }
  0x70   :  { %467 = vst [vmem:[#allocation4 + $0x68] sm:$0xff] %v466_v28  ;;  %v470_v30 = vld [vmem:[%s3959_s17 + $0xf0] sm:$0xff]  ;;  %v472_v31 = vld [vmem:[%s3959_s17 + $0xf8] sm:$0xff]  ;;  %469 = vst [vmem:[#allocation4 + $0x198] sm:$0xff] %v468_v29 }
  0x71   :  { %471 = vst [vmem:[#allocation4 + $0x158] sm:$0xff] %v470_v30  ;;  %473 = vst [vmem:[#allocation4 + $0x190] sm:$0xff] %v472_v31  ;;  %v474_v32 = vld [vmem:[%s3959_s17 + $0x100] sm:$0xff]  ;;  %v476_v33 = vld [vmem:[%s3959_s17 + $0x108] sm:$0xff] }
  0x72   :  { %v478_v34 = vld [vmem:[%s3959_s17 + $0x110] sm:$0xff]  ;;  %475 = vst [vmem:[#allocation4 + $0x160] sm:$0xff] %v474_v32  ;;  %477 = vst [vmem:[#allocation4 + $0x168] sm:$0xff] %v476_v33  ;;  %v480_v35 = vld [vmem:[%s3959_s17 + $0x118] sm:$0xff] }
  0x73   :  { %479 = vst [vmem:[#allocation4 + $0x140] sm:$0xff] %v478_v34  ;;  %v482_v36 = vld [vmem:[%s3959_s17 + $0x120] sm:$0xff]  ;;  %v484_v37 = vld [vmem:[%s3959_s17 + $0x128] sm:$0xff]  ;;  %481 = vst [vmem:[#allocation4 + $0x108] sm:$0xff] %v480_v35 }
  0x74   :  { %483 = vst [vmem:[#allocation4 + $0xe0] sm:$0xff] %v482_v36  ;;  %485 = vst [vmem:[#allocation4 + $0xc8] sm:$0xff] %v484_v37  ;;  %v486_v38 = vld [vmem:[%s3959_s17 + $0x130] sm:$0xff]  ;;  %v488_v39 = vld [vmem:[%s3959_s17 + $0x138] sm:$0xff] }
  0x75   :  { %v490_v40 = vld [vmem:[%s3959_s17 + $0x140] sm:$0xff]  ;;  %487 = vst [vmem:[#allocation4 + $0x50] sm:$0xff] %v486_v38  ;;  %489 = vst [vmem:[#allocation4 + $0x60] sm:$0xff] %v488_v39  ;;  %v492_v41 = vld [vmem:[%s3959_s17 + $0x148] sm:$0xff] }
  0x76   :  { %491 = vst [vmem:[#allocation4 + $0xc0] sm:$0xff] %v490_v40  ;;  %v494_v42 = vld [vmem:[%s3959_s17 + $0x150] sm:$0xff]  ;;  %v496_v43 = vld [vmem:[%s3959_s17 + $0x158] sm:$0xff]  ;;  %493 = vst [vmem:[#allocation4 + $0x1a0] sm:$0xff] %v492_v41 }
  0x77   :  { %495 = vst [vmem:[#allocation4 + $0x1c8] sm:$0xff] %v494_v42  ;;  %497 = vst [vmem:[#allocation4 + $0xe8] sm:$0xff] %v496_v43  ;;  %v498_v44 = vld [vmem:[%s3959_s17 + $0x160] sm:$0xff]  ;;  %v500_v45 = vld [vmem:[%s3959_s17 + $0x168] sm:$0xff] }
  0x78   :  { %v502_v46 = vld [vmem:[%s3959_s17 + $0x170] sm:$0xff]  ;;  %499 = vst [vmem:[#allocation4 + $0x170] sm:$0xff] %v498_v44  ;;  %501 = vst [vmem:[#allocation4 + $0xd0] sm:$0xff] %v500_v45  ;;  %v504_v47 = vld [vmem:[%s3959_s17 + $0x178] sm:$0xff] }
  0x79   :  { %503 = vst [vmem:[#allocation4 + $0x1b8] sm:$0xff] %v502_v46  ;;  %v506_v48 = vld [vmem:[%s3959_s17 + $0x180] sm:$0xff]  ;;  %v508_v49 = vld [vmem:[%s3959_s17 + $0x188] sm:$0xff]  ;;  %505 = vst [vmem:[#allocation4 + $0x1f0] sm:$0xff] %v504_v47 }
  0x7a   :  { %507 = vst [vmem:[#allocation4 + $0x1c0] sm:$0xff] %v506_v48  ;;  %509 = vst [vmem:[#allocation4 + $0x1d8] sm:$0xff] %v508_v49  ;;  %v510_v50 = vld [vmem:[%s3959_s17 + $0x190] sm:$0xff]  ;;  %v512_v51 = vld [vmem:[%s3959_s17 + $0x198] sm:$0xff] }
  0x7b   :  { %v514_v52 = vld [vmem:[%s3959_s17 + $0x1a0] sm:$0xff]  ;;  %511 = vst [vmem:[#allocation4 + $0x58] sm:$0xff] %v510_v50  ;;  %513 = vst [vmem:[#allocation4 + $0xf0] sm:$0xff] %v512_v51  ;;  %v516_v53 = vld [vmem:[%s3959_s17 + $0x1a8] sm:$0xff] }
  0x7c   :  { %515 = vst [vmem:[#allocation4 + $0xb0] sm:$0xff] %v514_v52  ;;  %v518_v54 = vld [vmem:[%s3959_s17 + $0x1b0] sm:$0xff]  ;;  %v520_v55 = vld [vmem:[%s3959_s17 + $0x1b8] sm:$0xff]  ;;  %517 = vst [vmem:[#allocation4 + $0x120] sm:$0xff] %v516_v53 }
  0x7d   :  { %519 = vst [vmem:[#allocation4 + $0x98] sm:$0xff] %v518_v54  ;;  %521 = vst [vmem:[#allocation4 + $0x150] sm:$0xff] %v520_v55  ;;  %v522_v56 = vld [vmem:[%s3959_s17 + $0x1c0] sm:$0xff]  ;;  %v524_v57 = vld [vmem:[%s3959_s17 + $0x1c8] sm:$0xff] }
  0x7e   :  { %v526_v58 = vld [vmem:[%s3959_s17 + $0x1d0] sm:$0xff]  ;;  %523 = vst [vmem:[#allocation4 + $0x180] sm:$0xff] %v522_v56  ;;  %525 = vst [vmem:[#allocation4 + $0x188] sm:$0xff] %v524_v57  ;;  %v528_v59 = vld [vmem:[%s3959_s17 + $0x1d8] sm:$0xff] }
  0x7f   :  { %527 = vst [vmem:[#allocation4 + $0x88] sm:$0xff] %v526_v58  ;;  %v530_v60 = vld [vmem:[%s3959_s17 + $0x1e0] sm:$0xff]  ;;  %v532_v61 = vld [vmem:[%s3959_s17 + $0x1e8] sm:$0xff]  ;;  %529 = vst [vmem:[#allocation4 + $0x1e0] sm:$0xff] %v528_v59 }
  0x80   :  { %531 = vst [vmem:[#allocation4 + $0x110] sm:$0xff] %v530_v60  ;;  %533 = vst [vmem:[#allocation4 + $0x1b0] sm:$0xff] %v532_v61  ;;  %v534_v62 = vld [vmem:[%s3959_s17 + $0x1f0] sm:$0xff]  ;;  %v536_v63 = vld [vmem:[%s3959_s17 + $0x1f8] sm:$0xff] }
  0x81   :  { %535 = vst [vmem:[#allocation4 + $0xd8] sm:$0xff] %v534_v62  ;;  %537 = vst [vmem:[#allocation4 + $0x1f8] sm:$0xff] %v536_v63 }
  0x82   :  { %545 = vsyncadd [#allocation6 + $0x1], 8192  ;;  %v565_v0 = vld [vmem:[%s3958_s16] sm:$0xf] }
  0x83   :  { %566 = vst [vmem:[#allocation3] sm:$0xf] %v565_v0 }
  0x84   :  { %592 = vsyncadd [#allocation6 + $0x2], 64  ;;  %v612_v1 = vld [vmem:[%s3960_s18] sm:$0x1] }
  0x85   :  { %613 = vst [vmem:[#allocation5] sm:$0x1] %v612_v1 }
  0x86   :  { %639 = vsyncadd [#allocation6 + $0x3], 16  ;;  %s3967_s15 = sld [smem:[#allocation23_spill]]  ;;  %v2482_v6 = vmov 0.0   ;;  %v876_v17 = vld [vmem:[%s3946_s4 + $0xf8] sm:$0xff]  ;;  %v875_v18 = vld [vmem:[%s3946_s4 + $0xf0] sm:$0xff] }
  0x87   :  { %763 = vmatprep.mubr.f32.mxu1 %v2482_v6  ;;  %985 = vmatprep.subr.mxu0 %v876_v17  ;;  %v874_v20 = vld [vmem:[%s3946_s4 + $0xe8] sm:$0xff]  ;;  %v873_v21 = vld [vmem:[%s3946_s4 + $0xe0] sm:$0xff]  ;;  %v872_v23 = vld [vmem:[%s3946_s4 + $0xd8] sm:$0xff]  ;;  %s3968_s21 = sld [smem:[#allocation21_spill]]  ;;  %vm695_vm0 = vcmask 523264   ;;  %s2483_s27 = smov 8  }
  0x88   :  { %986 = vmatpush1.msra.mxu0 %v875_v18  ;;  %v871_v28 = vld [vmem:[%s3946_s4 + $0xd0] sm:$0xff]  ;;  %v870_v30 = vld [vmem:[%s3946_s4 + $0xc8] sm:$0xff]  ;;  %v869_v32 = vld [vmem:[%s3946_s4 + $0xc0] sm:$0xff]  ;;  %s3969_s26 = sld [smem:[#allocation24_spill]]  ;;  %vm1260_vm1 = vcmask 64512   ;;  %s3809_s30 = smov 0  }
  0x89   :  { %987 = vmatprep.subr.mxu0 %v874_v20  ;;  %v868_v34 = vld [vmem:[%s3946_s4 + $0xb8] sm:$0xff]  ;;  %v867_v36 = vld [vmem:[%s3946_s4 + $0xb0] sm:$0xff]  ;;  %v866_v38 = vld [vmem:[%s3946_s4 + $0xa8] sm:$0xff]  ;;  %s1264_s0 = sld [smem:[#allocation7]] }
  0x8a   :  { %988 = vmatpush1.msra.mxu0 %v873_v21  ;;  %v865_v40 = vld [vmem:[%s3946_s4 + $0xa0] sm:$0xff]  ;;  %v864_v42 = vld [vmem:[%s3946_s4 + $0x98] sm:$0xff]  ;;  %v863_v44 = vld [vmem:[%s3946_s4 + $0x90] sm:$0xff] }
  0x8b   :  { %989 = vmatprep.subr.mxu0 %v872_v23  ;;  %v862_v46 = vld [vmem:[%s3946_s4 + $0x88] sm:$0xff]  ;;  %v861_v48 = vld [vmem:[%s3946_s4 + $0x80] sm:$0xff]  ;;  %v860_v50 = vld [vmem:[%s3946_s4 + $0x78] sm:$0xff] }
  0x8c   :  { %v670_v2 = vld [vmem:[%s3967_s15 + $0xe8] sm:$0xff]  ;;  %v669_v3 = vld [vmem:[%s3967_s15 + $0xe0] sm:$0xff]  ;;  %v672_v25 = vld [vmem:[%s3967_s15 + $0xf8] sm:$0xff]  ;;  %990 = vmatpush1.msra.mxu0 %v871_v28 }
  0x8d   :  { %715 = vmatprep.subr.mxu1 %v670_v2  ;;  %v666_v4 = vld [vmem:[%s3967_s15 + $0xc8] sm:$0xff]  ;;  %v665_v5 = vld [vmem:[%s3967_s15 + $0xc0] sm:$0xff]  ;;  %v671_v26 = vld [vmem:[%s3967_s15 + $0xf0] sm:$0xff]  ;;  %991 = vmatprep.subr.mxu0 %v870_v30 }
  0x8e   :  { %716 = vmatpush1.msra.mxu1 %v669_v3  ;;  %v662_v7 = vld [vmem:[%s3967_s15 + $0xa8] sm:$0xff]  ;;  %v661_v8 = vld [vmem:[%s3967_s15 + $0xa0] sm:$0xff]  ;;  %v668_v27 = vld [vmem:[%s3967_s15 + $0xd8] sm:$0xff]  ;;  %992 = vmatpush1.msra.mxu0 %v869_v32 }
  0x8f   :  { %717 = vmatprep.subr.mxu1 %v666_v4  ;;  %v658_v9 = vld [vmem:[%s3967_s15 + $0x88] sm:$0xff]  ;;  %v657_v10 = vld [vmem:[%s3967_s15 + $0x80] sm:$0xff]  ;;  %v667_v29 = vld [vmem:[%s3967_s15 + $0xd0] sm:$0xff]  ;;  %993 = vmatprep.subr.mxu0 %v868_v34 }
  0x90   :  { %718 = vmatpush1.msra.mxu1 %v665_v5  ;;  %v654_v11 = vld [vmem:[%s3967_s15 + $0x68] sm:$0xff]  ;;  %v653_v12 = vld [vmem:[%s3967_s15 + $0x60] sm:$0xff]  ;;  %v664_v31 = vld [vmem:[%s3967_s15 + $0xb8] sm:$0xff]  ;;  %994 = vmatpush1.msra.mxu0 %v867_v36 }
  0x91   :  { %719 = vmatprep.subr.mxu1 %v662_v7  ;;  %v650_v13 = vld [vmem:[%s3967_s15 + $0x48] sm:$0xff]  ;;  %v649_v14 = vld [vmem:[%s3967_s15 + $0x40] sm:$0xff]  ;;  %v663_v33 = vld [vmem:[%s3967_s15 + $0xb0] sm:$0xff]  ;;  %995 = vmatprep.subr.mxu0 %v866_v38 }
  0x92   :  { %720 = vmatpush1.msra.mxu1 %v661_v8  ;;  %v646_v15 = vld [vmem:[%s3967_s15 + $0x28] sm:$0xff]  ;;  %v645_v16 = vld [vmem:[%s3967_s15 + $0x20] sm:$0xff]  ;;  %v660_v35 = vld [vmem:[%s3967_s15 + $0x98] sm:$0xff]  ;;  %996 = vmatpush1.msra.mxu0 %v865_v40 }
  0x93   :  { %721 = vmatprep.subr.mxu1 %v658_v9  ;;  %v642_v19 = vld [vmem:[%s3967_s15 + $0x8] sm:$0xff]  ;;  %v641_v22 = vld [vmem:[%s3967_s15] sm:$0xff]  ;;  %v659_v37 = vld [vmem:[%s3967_s15 + $0x90] sm:$0xff]  ;;  %997 = vmatprep.subr.mxu0 %v864_v42 }
  0x94   :  { %722 = vmatpush1.msra.mxu1 %v657_v10  ;;  %v3242_v24 = vld [vmem:[%s3968_s21] sm:$0xff]  ;;  %v656_v39 = vld [vmem:[%s3967_s15 + $0x78] sm:$0xff]  ;;  %v655_v41 = vld [vmem:[%s3967_s15 + $0x70] sm:$0xff]  ;;  %998 = vmatpush1.msra.mxu0 %v863_v44 }
  0x95   :  { %723 = vmatprep.subr.mxu1 %v654_v11  ;;  %v652_v43 = vld [vmem:[%s3967_s15 + $0x58] sm:$0xff]  ;;  %v651_v45 = vld [vmem:[%s3967_s15 + $0x50] sm:$0xff]  ;;  %999 = vmatprep.subr.mxu0 %v862_v46  ;;  %v858_v54 = vld [vmem:[%s3946_s4 + $0x68] sm:$0xff] }
  0x96   :  { %724 = vmatpush1.msra.mxu1 %v653_v12  ;;  %v648_v47 = vld [vmem:[%s3967_s15 + $0x38] sm:$0xff]  ;;  %v647_v49 = vld [vmem:[%s3967_s15 + $0x30] sm:$0xff]  ;;  %1000 = vmatpush1.msra.mxu0 %v861_v48  ;;  %v857_v57 = vld [vmem:[%s3946_s4 + $0x60] sm:$0xff] }
  0x97   :  { %725 = vmatprep.subr.mxu1 %v650_v13  ;;  %v644_v51 = vld [vmem:[%s3967_s15 + $0x18] sm:$0xff]  ;;  %v859_v52 = vld [vmem:[%s3946_s4 + $0x70] sm:$0xff]  ;;  %1001 = vmatprep.subr.mxu0 %v860_v50  ;;  %v938_v58 = vld [vmem:[%s3946_s4 + $0x2e8] sm:$0xff] }
  0x98   :  { %726 = vmatpush1.msra.mxu1 %v649_v14  ;;  %v643_v53 = vld [vmem:[%s3967_s15 + $0x10] sm:$0xff]  ;;  %v940_v55 = vld [vmem:[%s3946_s4 + $0x2f8] sm:$0xff]  ;;  %1002 = vmatpush1.msra.mxu0 %v859_v52  ;;  %v937_v60 = vld [vmem:[%s3946_s4 + $0x2e0] sm:$0xff] }
  0x99   :  { %727 = vmatprep.subr.mxu1 %v646_v15  ;;  %v939_v56 = vld [vmem:[%s3946_s4 + $0x2f0] sm:$0xff]  ;;  %1003 = vmatprep.subr.mxu0 %v858_v54  ;;  %v856_v59 = vld [vmem:[%s3946_s4 + $0x58] sm:$0xff]  ;;  %v854_v63 = vld [vmem:[%s3946_s4 + $0x48] sm:$0xff] }
  0x9a   :  { %728 = vmatpush1.msra.mxu1 %v645_v16  ;;  %v855_v61 = vld [vmem:[%s3946_s4 + $0x50] sm:$0xff]  ;;  %1004 = vmatpush1.msra.mxu0 %v857_v57  ;;  %v936_v62 = vld [vmem:[%s3946_s4 + $0x2d8] sm:$0xff]  ;;  %v853_v1 = vld [vmem:[%s3946_s4 + $0x40] sm:$0xff] }
  0x9b   :  { %729 = vmatprep.subr.mxu1 %v642_v19  ;;  %1005 = vmatprep.subr.mxu0 %v856_v59  ;;  %v935_v0 = vld [vmem:[%s3946_s4 + $0x2d0] sm:$0xff]  ;;  %v934_v2 = vld [vmem:[%s3946_s4 + $0x2c8] sm:$0xff]  ;;  %v852_v3 = vld [vmem:[%s3946_s4 + $0x38] sm:$0xff] }
  0x9c   :  { %730 = vmatpush1.msra.mxu1 %v641_v22  ;;  %1006 = vmatpush1.msra.mxu0 %v855_v61  ;;  %v933_v4 = vld [vmem:[%s3946_s4 + $0x2c0] sm:$0xff]  ;;  %v851_v5 = vld [vmem:[%s3946_s4 + $0x30] sm:$0xff]  ;;  %v932_v7 = vld [vmem:[%s3946_s4 + $0x2b8] sm:$0xff] }
  0x9d   :  { %2204 = vmatmul.mubr.msk.f32.vlgmr.msra.gmra.mxu1 %vm695_vm0, %v3242_v24  ;;  %786 = vmatprep.subr.mxu1 %v672_v25  ;;  %v850_v8 = vld [vmem:[%s3946_s4 + $0x28] sm:$0xff]  ;;  %v931_v9 = vld [vmem:[%s3946_s4 + $0x2b0] sm:$0xff]  ;;  %v849_v10 = vld [vmem:[%s3946_s4 + $0x20] sm:$0xff] }
  0x9e   :  { %787 = vmatpush1.msra.mxu1 %v671_v26  ;;  %834 = vmatprep.mubr.f32.mxu1 %v2482_v6  ;;  %v930_v11 = vld [vmem:[%s3946_s4 + $0x2a8] sm:$0xff]  ;;  %v848_v12 = vld [vmem:[%s3946_s4 + $0x18] sm:$0xff]  ;;  %v929_v13 = vld [vmem:[%s3946_s4 + $0x2a0] sm:$0xff] }
  0x9f   :  { %788 = vmatprep.subr.mxu1 %v668_v27  ;;  %1007 = vmatprep.subr.mxu0 %v854_v63  ;;  %v847_v14 = vld [vmem:[%s3946_s4 + $0x10] sm:$0xff]  ;;  %v928_v15 = vld [vmem:[%s3946_s4 + $0x298] sm:$0xff]  ;;  %v846_v16 = vld [vmem:[%s3946_s4 + $0x8] sm:$0xff] }
  0xa0   :  { %789 = vmatpush1.msra.mxu1 %v667_v29  ;;  %1008 = vmatpush1.msra.mxu0 %v853_v1  ;;  %v927_v17 = vld [vmem:[%s3946_s4 + $0x290] sm:$0xff]  ;;  %v845_v18 = vld [vmem:[%s3946_s4] sm:$0xff]  ;;  %v926_v19 = vld [vmem:[%s3946_s4 + $0x288] sm:$0xff] }
  0xa1   :  { %790 = vmatprep.subr.mxu1 %v664_v31  ;;  %1009 = vmatprep.subr.mxu0 %v852_v3  ;;  %v908_v20 = vld [vmem:[%s3946_s4 + $0x1f8] sm:$0xff]  ;;  %v925_v21 = vld [vmem:[%s3946_s4 + $0x280] sm:$0xff]  ;;  %v907_v22 = vld [vmem:[%s3946_s4 + $0x1f0] sm:$0xff] }
  0xa2   :  { %791 = vmatpush1.msra.mxu1 %v663_v33  ;;  %1010 = vmatpush1.msra.mxu0 %v851_v5  ;;  %v924_v23 = vld [vmem:[%s3946_s4 + $0x278] sm:$0xff]  ;;  %v923_v25 = vld [vmem:[%s3946_s4 + $0x270] sm:$0xff]  ;;  %v905_v26 = vld [vmem:[%s3946_s4 + $0x1e0] sm:$0xff] }
  0xa3   :  { %792 = vmatprep.subr.mxu1 %v660_v35  ;;  %1011 = vmatprep.subr.mxu0 %v850_v8  ;;  %v922_v27 = vld [vmem:[%s3946_s4 + $0x268] sm:$0xff]  ;;  %v904_v28 = vld [vmem:[%s3946_s4 + $0x1d8] sm:$0xff]  ;;  %v921_v29 = vld [vmem:[%s3946_s4 + $0x260] sm:$0xff] }
  0xa4   :  { %793 = vmatpush1.msra.mxu1 %v659_v37  ;;  %1012 = vmatpush1.msra.mxu0 %v849_v10  ;;  %v903_v30 = vld [vmem:[%s3946_s4 + $0x1d0] sm:$0xff]  ;;  %v920_v31 = vld [vmem:[%s3946_s4 + $0x258] sm:$0xff]  ;;  %v902_v32 = vld [vmem:[%s3946_s4 + $0x1c8] sm:$0xff]  ;;  %v675_v10 = vlaneseq }
  0xa5   :  { %794 = vmatprep.subr.mxu1 %v656_v39  ;;  %1013 = vmatprep.subr.mxu0 %v848_v12  ;;  %v919_v33 = vld [vmem:[%s3946_s4 + $0x250] sm:$0xff]  ;;  %v901_v34 = vld [vmem:[%s3946_s4 + $0x1c0] sm:$0xff]  ;;  %v918_v35 = vld [vmem:[%s3946_s4 + $0x248] sm:$0xff] }
  0xa6   :  { %795 = vmatpush1.msra.mxu1 %v655_v41  ;;  %1014 = vmatpush1.msra.mxu0 %v847_v14  ;;  %v900_v36 = vld [vmem:[%s3946_s4 + $0x1b8] sm:$0xff]  ;;  %v917_v37 = vld [vmem:[%s3946_s4 + $0x240] sm:$0xff]  ;;  %v899_v38 = vld [vmem:[%s3946_s4 + $0x1b0] sm:$0xff] }
  0xa7   :  { %796 = vmatprep.subr.mxu1 %v652_v43  ;;  %1015 = vmatprep.subr.mxu0 %v846_v16  ;;  %v916_v39 = vld [vmem:[%s3946_s4 + $0x238] sm:$0xff]  ;;  %v898_v40 = vld [vmem:[%s3946_s4 + $0x1a8] sm:$0xff]  ;;  %v915_v41 = vld [vmem:[%s3946_s4 + $0x230] sm:$0xff] }
  0xa8   :  { %797 = vmatpush1.msra.mxu1 %v651_v45  ;;  %1016 = vmatpush1.msra.mxu0 %v845_v18  ;;  %v897_v42 = vld [vmem:[%s3946_s4 + $0x1a0] sm:$0xff]  ;;  %v914_v43 = vld [vmem:[%s3946_s4 + $0x228] sm:$0xff]  ;;  %v896_v44 = vld [vmem:[%s3946_s4 + $0x198] sm:$0xff] }
  0xa9   :  { %798 = vmatprep.subr.mxu1 %v648_v47  ;;  %1017 = vmatprep.subr.mxu0 %v908_v20  ;;  %v913_v45 = vld [vmem:[%s3946_s4 + $0x220] sm:$0xff]  ;;  %v895_v46 = vld [vmem:[%s3946_s4 + $0x190] sm:$0xff]  ;;  %v912_v47 = vld [vmem:[%s3946_s4 + $0x218] sm:$0xff] }
  0xaa   :  { %799 = vmatpush1.msra.mxu1 %v647_v49  ;;  %1018 = vmatpush2.msra.mxu0 %v907_v22  ;;  %v894_v48 = vld [vmem:[%s3946_s4 + $0x188] sm:$0xff]  ;;  %v911_v49 = vld [vmem:[%s3946_s4 + $0x210] sm:$0xff]  ;;  %v893_v50 = vld [vmem:[%s3946_s4 + $0x180] sm:$0xff] }
  0xab   :  { %800 = vmatprep.subr.mxu1 %v644_v51  ;;  %v910_v51 = vld [vmem:[%s3946_s4 + $0x208] sm:$0xff]  ;;  %v892_v52 = vld [vmem:[%s3946_s4 + $0x178] sm:$0xff]  ;;  %v891_v54 = vld [vmem:[%s3946_s4 + $0x170] sm:$0xff] }
  0xac   :  { %801 = vmatpush1.msra.mxu1 %v643_v53  ;;  %v909_v53 = vld [vmem:[%s3946_s4 + $0x200] sm:$0xff]  ;;  %v971_v57 = vld [vmem:[%s3946_s4 + $0x3f0] sm:$0xff]  ;;  %v970_v59 = vld [vmem:[%s3946_s4 + $0x3e8] sm:$0xff] }
  0xad   :  { %2205 = vmatmul.mubr.msk.f32.vlgmr.msra.gmra.mxu1 %vm695_vm0, %v3242_v24  ;;  %1056 = vmatprep.subr.mxu1 %v940_v55  ;;  %v906_v24 = vld [vmem:[%s3946_s4 + $0x1e8] sm:$0xff]  ;;  %v972_v55 = vld [vmem:[%s3946_s4 + $0x3f8] sm:$0xff]  ;;  %v969_v61 = vld [vmem:[%s3946_s4 + $0x3e0] sm:$0xff] }
  0xae   :  { %1057 = vmatpush1.msra.mxu1 %v939_v56  ;;  %1019 = vmatprep.subr.mxu0 %v906_v24  ;;  %v890_v56 = vld [vmem:[%s3946_s4 + $0x168] sm:$0xff]  ;;  %v968_v63 = vld [vmem:[%s3946_s4 + $0x3d8] sm:$0xff]  ;;  %v967_v1 = vld [vmem:[%s3946_s4 + $0x3d0] sm:$0xff] }
  0xaf   :  { %1058 = vmatprep.subr.mxu1 %v938_v58  ;;  %1020 = vmatpush2.msra.mxu0 %v905_v26  ;;  %v889_v58 = vld [vmem:[%s3946_s4 + $0x160] sm:$0xff]  ;;  %v966_v3 = vld [vmem:[%s3946_s4 + $0x3c8] sm:$0xff]  ;;  %v884_v5 = vld [vmem:[%s3946_s4 + $0x138] sm:$0xff] }
  0xb0   :  { %1059 = vmatpush1.msra.mxu1 %v937_v60  ;;  %1021 = vmatprep.subr.mxu0 %v904_v28  ;;  %v888_v60 = vld [vmem:[%s3946_s4 + $0x158] sm:$0xff]  ;;  %v883_v8 = vld [vmem:[%s3946_s4 + $0x130] sm:$0xff]  ;;  %v962_v12 = vld [vmem:[%s3946_s4 + $0x3a8] sm:$0xff] }
  0xb1   :  { %1060 = vmatprep.subr.mxu1 %v936_v62  ;;  %1022 = vmatpush2.msra.mxu0 %v903_v30  ;;  %v887_v62 = vld [vmem:[%s3946_s4 + $0x150] sm:$0xff]  ;;  %v961_v14 = vld [vmem:[%s3946_s4 + $0x3a0] sm:$0xff]  ;;  %v880_v16 = vld [vmem:[%s3946_s4 + $0x118] sm:$0xff] }
  0xb2   :  { %1061 = vmatpush1.msra.mxu1 %v935_v0  ;;  %1023 = vmatprep.subr.mxu0 %v902_v32  ;;  %v886_v0 = vld [vmem:[%s3946_s4 + $0x148] sm:$0xff]  ;;  %v879_v18 = vld [vmem:[%s3946_s4 + $0x110] sm:$0xff]  ;;  %v877_v22 = vld [vmem:[%s3946_s4 + $0x100] sm:$0xff] }
  0xb3   :  { %1062 = vmatprep.subr.mxu1 %v934_v2  ;;  %1024 = vmatpush2.msra.mxu0 %v901_v34  ;;  %v885_v2 = vld [vmem:[%s3946_s4 + $0x140] sm:$0xff]  ;;  %v878_v20 = vld [vmem:[%s3946_s4 + $0x108] sm:$0xff]  ;;  %v956_v24 = vld [vmem:[%s3946_s4 + $0x378] sm:$0xff] }
  0xb4   :  { %1063 = vmatpush1.msra.mxu1 %v933_v4  ;;  %1025 = vmatprep.subr.mxu0 %v900_v36  ;;  %v965_v4 = vld [vmem:[%s3946_s4 + $0x3c0] sm:$0xff]  ;;  %v954_v26 = vld [vmem:[%s3946_s4 + $0x368] sm:$0xff]  ;;  %v952_v28 = vld [vmem:[%s3946_s4 + $0x358] sm:$0xff] }
  0xb5   :  { %1064 = vmatprep.subr.mxu1 %v932_v7  ;;  %1026 = vmatpush2.msra.mxu0 %v899_v38  ;;  %v964_v7 = vld [vmem:[%s3946_s4 + $0x3b8] sm:$0xff]  ;;  %v950_v30 = vld [vmem:[%s3946_s4 + $0x348] sm:$0xff] }
  0xb6   :  { %1065 = vmatpush1.msra.mxu1 %v931_v9  ;;  %1027 = vmatprep.subr.mxu0 %v898_v40  ;;  %v963_v9 = vld [vmem:[%s3946_s4 + $0x3b0] sm:$0xff]  ;;  %v948_v32 = vld [vmem:[%s3946_s4 + $0x338] sm:$0xff]  ;;  %v946_v34 = vld [vmem:[%s3946_s4 + $0x328] sm:$0xff] }
  0xb7   :  { %1066 = vmatprep.subr.mxu1 %v930_v11  ;;  %1028 = vmatpush2.msra.mxu0 %v897_v42  ;;  %v882_v11 = vld [vmem:[%s3946_s4 + $0x128] sm:$0xff]  ;;  %v944_v36 = vld [vmem:[%s3946_s4 + $0x318] sm:$0xff] }
  0xb8   :  { %1067 = vmatpush1.msra.mxu1 %v929_v13  ;;  %1029 = vmatprep.subr.mxu0 %v896_v44  ;;  %v881_v13 = vld [vmem:[%s3946_s4 + $0x120] sm:$0xff]  ;;  %v942_v38 = vld [vmem:[%s3946_s4 + $0x308] sm:$0xff]  ;;  %v1160_v40 = vld [vmem:[%s3948_s6 + $0xf8] sm:$0xff] }
  0xb9   :  { %1068 = vmatprep.subr.mxu1 %v928_v15  ;;  %1030 = vmatpush2.msra.mxu0 %v895_v46  ;;  %v3594_v15 = vand.u32 127, %v675_v10 }
  0xba   :  { %1069 = vmatpush1.msra.mxu1 %v927_v17  ;;  %1031 = vmatprep.subr.mxu0 %v894_v48  ;;  %v960_v17 = vld [vmem:[%s3946_s4 + $0x398] sm:$0xff] }
  0xbb   :  { %1070 = vmatprep.subr.mxu1 %v926_v19  ;;  %1032 = vmatpush2.msra.mxu0 %v893_v50  ;;  %v959_v19 = vld [vmem:[%s3946_s4 + $0x390] sm:$0xff] }
  0xbc   :  { %1071 = vmatpush1.msra.mxu1 %v925_v21  ;;  %1033 = vmatprep.subr.mxu0 %v892_v52  ;;  %v958_v21 = vld [vmem:[%s3946_s4 + $0x388] sm:$0xff] }
  0xbd   :  { %1072 = vmatprep.subr.mxu1 %v924_v23  ;;  %1034 = vmatpush2.msra.mxu0 %v891_v54  ;;  %v957_v23 = vld [vmem:[%s3946_s4 + $0x380] sm:$0xff]  ;;  %v1159_v54 = vld [vmem:[%s3948_s6 + $0xf0] sm:$0xff] }
  0xbe   :  { %1073 = vmatpush1.msra.mxu1 %v923_v25  ;;  %1035 = vmatprep.subr.mxu0 %v890_v56  ;;  %v955_v25 = vld [vmem:[%s3946_s4 + $0x370] sm:$0xff]  ;;  %v1158_v56 = vld [vmem:[%s3948_s6 + $0xe8] sm:$0xff] }
  0xbf   :  { %1074 = vmatprep.subr.mxu1 %v922_v27  ;;  %1036 = vmatpush2.msra.mxu0 %v889_v58  ;;  %v953_v27 = vld [vmem:[%s3946_s4 + $0x360] sm:$0xff]  ;;  %v1142_v58 = vld [vmem:[%s3948_s6 + $0x68] sm:$0xff] }
  0xc0   :  { %1075 = vmatpush1.msra.mxu1 %v921_v29  ;;  %1037 = vmatprep.subr.mxu0 %v888_v60  ;;  %v951_v29 = vld [vmem:[%s3946_s4 + $0x350] sm:$0xff]  ;;  %v1157_v60 = vld [vmem:[%s3948_s6 + $0xe0] sm:$0xff] }
  0xc1   :  { %1076 = vmatprep.subr.mxu1 %v920_v31  ;;  %1038 = vmatpush2.msra.mxu0 %v887_v62  ;;  %v949_v31 = vld [vmem:[%s3946_s4 + $0x340] sm:$0xff] }
  0xc2   :  { %1077 = vmatpush1.msra.mxu1 %v919_v33  ;;  %1039 = vmatprep.subr.mxu0 %v886_v0  ;;  %v947_v33 = vld [vmem:[%s3946_s4 + $0x330] sm:$0xff] }
  0xc3   :  { %1078 = vmatprep.subr.mxu1 %v918_v35  ;;  %1040 = vmatpush2.msra.mxu0 %v885_v2  ;;  %v945_v35 = vld [vmem:[%s3946_s4 + $0x320] sm:$0xff] }
  0xc4   :  { %1079 = vmatpush1.msra.mxu1 %v917_v37  ;;  %1041 = vmatprep.subr.mxu0 %v884_v5  ;;  %v943_v37 = vld [vmem:[%s3946_s4 + $0x310] sm:$0xff] }
  0xc5   :  { %1080 = vmatprep.subr.mxu1 %v916_v39  ;;  %1042 = vmatpush2.msra.mxu0 %v883_v8  ;;  %v941_v39 = vld [vmem:[%s3946_s4 + $0x300] sm:$0xff]  ;;  %v1140_v8 = vld [vmem:[%s3948_s6 + $0x58] sm:$0xff]  ;;  %s3970_s4 = sld [smem:[#allocation22_spill]] }
  0xc6   :  { %1081 = vmatpush1.msra.mxu1 %v915_v41  ;;  %1043 = vmatprep.subr.mxu0 %v882_v11  ;;  %v3671_v41 = vshrl.u32 %v675_v10, 7  ;;  %v1139_v10 = vld [vmem:[%s3948_s6 + $0x50] sm:$0xff]  ;;  %v1154_v11 = vld [vmem:[%s3948_s6 + $0xc8] sm:$0xff] }
  0xc7   :  { %1082 = vmatprep.subr.mxu1 %v914_v43  ;;  %1044 = vmatpush2.msra.mxu0 %v881_v13  ;;  %v673_v43 = vld [vmem:[%s3969_s26] sm:$0xf] }
  0xc8   :  { %1083 = vmatpush1.msra.mxu1 %v913_v45  ;;  %1045 = vmatprep.subr.mxu0 %v880_v16  ;;  %v3674_v42 = vsub.s32 0, %v3671_v41  ;;  %v3680_v44 = vsub.s32 1, %v3671_v41  ;;  %v1153_v13 = vld [vmem:[%s3948_s6 + $0xc0] sm:$0xff]  ;;  %v1152_v16 = vld [vmem:[%s3948_s6 + $0xb8] sm:$0xff] }
  0xc9   :  { %1084 = vmatprep.subr.mxu1 %v912_v47  ;;  %1046 = vmatpush2.msra.mxu0 %v879_v18  ;;  %v1151_v18 = vld [vmem:[%s3948_s6 + $0xb0] sm:$0xff] }
  0xca   :  { %1085 = vmatpush1.msra.mxu1 %v911_v49  ;;  %1047 = vmatprep.subr.mxu0 %v878_v20  ;;  %v678_v45 = vrot.slane %v673_v43, %v3674_v42  ;;  %v682_v46 = vrot.slane %v673_v43, %v3680_v44  ;;  %v1150_v20 = vld [vmem:[%s3948_s6 + $0xa8] sm:$0xff] }
  0xcb   :  { %1086 = vmatprep.subr.mxu1 %v910_v51  ;;  %1048 = vmatpush2.msra.mxu0 %v877_v22  ;;  %v1149_v22 = vld [vmem:[%s3948_s6 + $0xa0] sm:$0xff] }
  0xcc   :  { %1087 = vmatpush1.msra.mxu1 %v909_v53  ;;  %2246 = vmatprep.subr.mxu0 %v1160_v40  ;;  %v1144_v53 = vld [vmem:[%s3948_s6 + $0x78] sm:$0xff] }
  0xcd   :  { %1088 = vmatprep.subr.mxu1 %v972_v55  ;;  %v1143_v55 = vld [vmem:[%s3948_s6 + $0x70] sm:$0xff] }
  0xce   :  { %1089 = vmatpush2.msra.mxu1 %v971_v57  ;;  %v685_v57 = vsub.s32 2, %v3671_v41 }
  0xcf   :  { %1090 = vmatprep.subr.mxu1 %v970_v59  ;;  %v689_v59 = vsub.s32 3, %v3671_v41 }
  0xd0   :  { %1091 = vmatpush2.msra.mxu1 %v969_v61  ;;  %v1141_v61 = vld [vmem:[%s3948_s6 + $0x60] sm:$0xff]  ;;  %v686_v62 = vrot.slane %v673_v43, %v685_v57 }
  0xd1   :  { %1092 = vmatprep.subr.mxu1 %v968_v63  ;;  %v690_v63 = vrot.slane %v673_v43, %v689_v59 }
  0xd2   :  { %1093 = vmatpush2.msra.mxu1 %v967_v1 }
  0xd3   :  { %1094 = vmatprep.subr.mxu1 %v966_v3 }
  0xd4   :  { %1095 = vmatpush2.msra.mxu1 %v965_v4 }
  0xd5   :  { %1096 = vmatprep.subr.mxu1 %v964_v7  ;;  %v1156_v7 = vld [vmem:[%s3948_s6 + $0xd8] sm:$0xff] }
  0xd6   :  { %1097 = vmatpush2.msra.mxu1 %v963_v9  ;;  %v1155_v9 = vld [vmem:[%s3948_s6 + $0xd0] sm:$0xff] }
  0xd7   :  { %1098 = vmatprep.subr.mxu1 %v962_v12  ;;  %v1138_v12 = vld [vmem:[%s3948_s6 + $0x48] sm:$0xff] }
  0xd8   :  { %1099 = vmatpush2.msra.mxu1 %v961_v14  ;;  %v1137_v14 = vld [vmem:[%s3948_s6 + $0x40] sm:$0xff] }
  0xd9   :  { %1100 = vmatprep.subr.mxu1 %v960_v17  ;;  %v1136_v17 = vld [vmem:[%s3948_s6 + $0x38] sm:$0xff] }
  0xda   :  { %1101 = vmatpush2.msra.mxu1 %v959_v19  ;;  %v1135_v19 = vld [vmem:[%s3948_s6 + $0x30] sm:$0xff] }
  0xdb   :  { %1102 = vmatprep.subr.mxu1 %v958_v21  ;;  %v1134_v21 = vld [vmem:[%s3948_s6 + $0x28] sm:$0xff] }
  0xdc   :  { %1103 = vmatpush2.msra.mxu1 %v957_v23  ;;  %v1133_v23 = vld [vmem:[%s3948_s6 + $0x20] sm:$0xff] }
  0xdd   :  { %1104 = vmatprep.subr.mxu1 %v956_v24  ;;  %v1148_v24 = vld [vmem:[%s3948_s6 + $0x98] sm:$0xff] }
  0xde   :  { %1105 = vmatpush2.msra.mxu1 %v955_v25  ;;  %v1132_v25 = vld [vmem:[%s3948_s6 + $0x18] sm:$0xff] }
  0xdf   :  { %1106 = vmatprep.subr.mxu1 %v954_v26  ;;  %v1147_v26 = vld [vmem:[%s3948_s6 + $0x90] sm:$0xff] }
  0xe0   :  { %1107 = vmatpush2.msra.mxu1 %v953_v27  ;;  %v1131_v27 = vld [vmem:[%s3948_s6 + $0x10] sm:$0xff] }
  0xe1   :  { %1108 = vmatprep.subr.mxu1 %v952_v28  ;;  %v1146_v28 = vld [vmem:[%s3948_s6 + $0x88] sm:$0xff] }
  0xe2   :  { %1109 = vmatpush2.msra.mxu1 %v951_v29  ;;  %v1130_v29 = vld [vmem:[%s3948_s6 + $0x8] sm:$0xff] }
  0xe3   :  { %1110 = vmatprep.subr.mxu1 %v950_v30  ;;  %v1145_v30 = vld [vmem:[%s3948_s6 + $0x80] sm:$0xff] }
  0xe4   :  { %1111 = vmatpush2.msra.mxu1 %v949_v31  ;;  %v1129_v31 = vld [vmem:[%s3948_s6] sm:$0xff] }
  0xe5   :  { %1112 = vmatprep.subr.mxu1 %v948_v32  ;;  %v973_v32 = vld [vmem:[%s3947_s5] sm:$0x3] }
  0xe6   :  { %1113 = vmatpush2.msra.mxu1 %v947_v33 }
  0xe7   :  { %1114 = vmatprep.subr.mxu1 %v946_v34  ;;  %v978_v34 = vrot.slane %v973_v32, %v3674_v42 }
  0xe8   :  { %1115 = vmatpush2.msra.mxu1 %v945_v35  ;;  %v982_v35 = vrot.slane %v973_v32, %v3680_v44 }
  0xe9   :  { %1116 = vmatprep.subr.mxu1 %v944_v36 }
  0xea   :  { %1117 = vmatpush2.msra.mxu1 %v943_v37 }
  0xeb   :  { %1118 = vmatprep.subr.mxu1 %v942_v38 }
  0xec   :  { %1119 = vmatpush2.msra.mxu1 %v941_v39 }
 0x15d   :  { %v765_v47 = vpop.f32.mrf.mxu1 }
 0x15e   :  { %v766_v48 = vadd.f32 %v765_v47, %v678_v45 }
 0x15f   :  { %v767_v49 = vpop.f32.mrf.mxu1 }
 0x160   :  { %v768_v50 = vadd.f32 %v767_v49, %v682_v46  ;;  %v841_v52 = vmax.f32 %v766_v48, 0.0  ;;  %v2206_v49 = vld [vmem:[%s3949_s7] ss:$0 sm:$0xff]  ;;  %s2484_s7 = smov 120  }
 0x162   :  { %v842_v51 = vmax.f32 %v768_v50, 0.0 }
 0x164   :  { %1049 = vmatprep.mubr.f32.mxu0 %v842_v51 }
 0x165   :  { %1050 = vmatmul.mubr.f32.vlgmr.msra.gmra.mxu0 %v841_v52 }
 0x166   :  { %2247 = vmatpush3.msra.mxu0 %v1144_v53 }
 0x167   :  { %2248 = vmatprep.subr.mxu0 %v1159_v54 }
 0x168   :  { %2249 = vmatpush3.msra.mxu0 %v1143_v55  ;;  %v1241_v55 = vld [vmem:[%s3970_s4] sm:$0xff] }
 0x169   :  { %2250 = vmatprep.subr.mxu0 %v1158_v56 }
 0x16a   :  { %2251 = vmatpush3.msra.mxu0 %v1142_v58 }
 0x16b   :  { %2252 = vmatprep.subr.mxu0 %v1157_v60  ;;  %v1250_v60 = vld [vmem:[%s3951_s9] sm:$0xff] }
 0x16c   :  { %2253 = vmatpush3.msra.mxu0 %v1141_v61 }
 0x16d   :  { %v836_v0 = vpop.f32.mrf.mxu1  ;;  %2254 = vmatprep.subr.mxu0 %v1156_v7  ;;  %v3803_v7 = vmov 0.0  }
 0x16e   :  { %v837_v1 = vadd.f32 %v836_v0, %v686_v62  ;;  %2255 = vmatpush3.msra.mxu0 %v1140_v8 }
 0x16f   :  { %v838_v2 = vpop.f32.mrf.mxu1  ;;  %2256 = vmatprep.subr.mxu0 %v1155_v9 }
 0x170   :  { %v839_v3 = vadd.f32 %v838_v2, %v690_v63  ;;  %v843_v5 = vmax.f32 %v837_v1, 0.0  ;;  %2257 = vmatpush3.msra.mxu0 %v1139_v10 }
 0x171   :  { %2258 = vmatprep.subr.mxu0 %v1154_v11 }
 0x172   :  { %v844_v4 = vmax.f32 %v839_v3, 0.0  ;;  %2259 = vmatpush3.msra.mxu0 %v1138_v12  ;;  %v1265_v3 = vstv %s1264_s0 }
 0x173   :  { %2260 = vmatprep.subr.mxu0 %v1153_v13 }
 0x174   :  { %1120 = vmatprep.mubr.f32.mxu1 %v844_v4  ;;  %2261 = vmatpush3.msra.mxu0 %v1137_v14 }
 0x175   :  { %1121 = vmatmul.mubr.f32.vlgmr.msra.gmra.mxu1 %v843_v5  ;;  %2262 = vmatprep.subr.mxu0 %v1152_v16 }
 0x176   :  { %2263 = vmatpush3.msra.mxu0 %v1136_v17 }
 0x177   :  { %2264 = vmatprep.subr.mxu0 %v1151_v18 }
 0x178   :  { %2265 = vmatpush3.msra.mxu0 %v1135_v19 }
 0x179   :  { %2266 = vmatprep.subr.mxu0 %v1150_v20 }
 0x17a   :  { %2267 = vmatpush3.msra.mxu0 %v1134_v21 }
 0x17b   :  { %2268 = vmatprep.subr.mxu0 %v1149_v22 }
 0x17c   :  { %2269 = vmatpush3.msra.mxu0 %v1133_v23 }
 0x17d   :  { %2270 = vmatprep.subr.mxu0 %v1148_v24 }
 0x17e   :  { %2271 = vmatpush3.msra.mxu0 %v1132_v25 }
 0x17f   :  { %2272 = vmatprep.subr.mxu0 %v1147_v26 }
 0x180   :  { %2273 = vmatpush3.msra.mxu0 %v1131_v27 }
 0x181   :  { %2274 = vmatprep.subr.mxu0 %v1146_v28 }
 0x182   :  { %2275 = vmatpush3.msra.mxu0 %v1130_v29 }
 0x183   :  { %2276 = vmatprep.subr.mxu0 %v1145_v30 }
 0x184   :  { %2277 = vmatpush3.msra.mxu0 %v1129_v31 }
 0x225   :  { %v1051_v33 = vpop.f32.mrf.mxu0 }
 0x226   :  { %v1052_v37 = vadd.f32 %v1051_v33, %v978_v34 }
 0x227   :  { %v1053_v36 = vpop.f32.mrf.mxu0 }
 0x228   :  { %v1054_v39 = vadd.f32 %v1053_v36, %v982_v35 }
 0x235   :  { %v1122_v38 = vpop.f32.mrf.mxu1 }
 0x236   :  { %v1123_v40 = vadd.f32 %v1122_v38, %v1052_v37 }
 0x237   :  { %v1124_v43 = vpop.f32.mrf.mxu1 }
 0x238   :  { %v1125_v45 = vadd.f32 %v1124_v43, %v1054_v39  ;;  %v1127_v47 = vmax.f32 %v1123_v40, 0.0 }
 0x23a   :  { %v1128_v46 = vmax.f32 %v1125_v45, 0.0 }
 0x23c   :  { %1232 = vmatprep.mubr.f32.mxu0 %v1128_v46 }
 0x23d   :  { %1233 = vmatmul.mubr.f32.vlgmr.msra.gmra.mxu0 %v1127_v47 }
 0x2fd   :  { %v2278_v48 = vpop.f32.mrf.mxu0 }
 0x2ff   :  { %v2279_v50 = vpop.f32.mrf.mxu0 }
 0x300   :  { %v2280_v51 = vadd.f32 %v2279_v50, %v2278_v48 }
 0x302   :  { %v3791_v52 = vadd.f32 %v2280_v51, %v2206_v49 }
 0x304   :  { %v1238_v53 = vmul.f32 0.5, %v3791_v52 }
 0x306   :  { %v1239_v54 = vmul.f32 1.442695, %v1238_v53 }
 0x308   :  { %2394 = vpow2.f32 %v1239_v54 }
 0x315   :  { %v2395_v56 = vpop.eup %2394 }
 0x316   :  { %v1242_v58 = vmul.f32 %v2395_v56, %v1241_v55 }
 0x318   :  { %1244 = vrot.lane.b32.xlu0 %v1242_v58, %s2483_s27 }
 0x31c   :  { %1252 = vrot.lane.b32.xlu0 %v1250_v60, %s2483_s27 }
 0x38a   :  { %v1245_v61 = vpop.permute.xlu0 %1244 }
 0x38b   :  { %v1247_v62 = vadd.f32 %v1245_v61, %v3791_v52  }
 0x38e   :  { %v1253_v63 = vpop.permute.xlu0 %1252 }
 0x38f   :  { %v1255_v0 = vmul.f32 %v1253_v63, %v1247_v62 }
 0x391   :  { %1257 = vrot.lane.b32.xlu1 %v1255_v0, %s2484_s7 }
 0x403   :  { %v1258_v1 = vpop.permute.xlu1 %1257 }
 0x404   :  { %v1261_v2 = vsel %vm1260_vm1, %v1258_v1, 0.0 }
 0x405   :  { %1262 = vadd.xlane.f32.xlu1 %v1261_v2 }
 0x48e   :  { %v1263_v4 = vpop.xlane.xlu1 %1262 }
 0x48f   :  { %v1266_v5 = vadd.f32 %v1265_v3, %v1263_v4  }
 0x490 LB: > { %s2238_s17 = sshll.u32 %s2478_s30, 5  ;;  %2396 = vtanh.f32 %v2470_v5  ;;  %s2485_s16 = smov 8   ;;  %s2478_s30 = sphi %s3809_s30, %s1272_s30   ;;  %v2474_v62 = vphi %v1247_v62, %v3974_v62   ;;  %v2470_v5 = vphi %v1266_v5, %v1406_v5   ;;  %v2466_v7 = vphi %v3803_v7, %v3973_v7  }
 0x491   : > { %s3823_s1 = scalar_lea.vmem %s3951_s9, %s2238_s17  ;;  %s3830_s2 = scalar_lea.vmem %s3950_s8, %s2238_s17 }
 0x492   : > { %v2210_v8 = vld [vmem:[%s3823_s1 + $0x8] sm:$0xff]  ;;  %v1303_v9 = vld [vmem:[%s3830_s2] sm:$0xff]  ;;  %v2214_v12 = vld [vmem:[%s3823_s1 + $0x10] sm:$0xff]  ;;  %s2486_s23 = smov 120   ;;  %s3843_s15 = sshll.u32 %s2478_s30, 2 }
 0x493   : > { %1282 = vrot.lane.b32.xlu0 %v2210_v8, %s2485_s16  ;;  %v2220_v24 = vld [vmem:[%s3823_s1 + $0x18] sm:$0xff]  ;;  %s3846_s24 = sadd.s32 1, %s3843_s15  ;;  %s1297_s10 = sld [smem:[#allocation9 + %s3843_s15]]  ;;  %v2217_v33 = vld [vmem:[%s3830_s2 + $0x8] sm:$0xff]  ;;  %v2226_v34 = vld [vmem:[%s3823_s1 + $0x20] sm:$0xff] }
 0x494   : > { %s1293_s11 = sld [smem:[#allocation7 + %s3846_s24]]  ;;  %s1313_s25 = sadd.s32 2, %s3843_s15  ;;  %v1310_v43 = vstv %s3843_s15  ;;  %v1345_v45 = vstv %s3846_s24  ;;  %v2223_v61 = vld [vmem:[%s3830_s2 + $0x10] sm:$0xff] }
 0x495   : > { %s1329_s6 = sld [smem:[#allocation7 + %s1313_s25]]  ;;  %vm1311_vm2 = vcmp.eq.s32.totalorder %v3594_v15, %v1310_v43  ;;  %v1380_v46 = vstv %s1313_s25  ;;  %vm1346_vm3 = vcmp.eq.s32.totalorder %v3594_v15, %v1345_v45  ;;  %s1348_s26 = sadd.s32 3, %s3843_s15 }
 0x496   : > { %s1333_s3 = sld [smem:[#allocation9 + %s3846_s24]]  ;;  %vm3862_vm4 = vcmp.eq.s32.totalorder %v3594_v15, %v1380_v46  ;;  %s1383_s28 = sadd.s32 4, %s3843_s15 }
 0x497   : > { %s1368_s5 = sld [smem:[#allocation9 + %s1313_s25]]  ;;  %s1272_s30 = sadd.s32 1, %s2478_s30  }
 0x498   : > { %s1364_s4 = sld [smem:[#allocation7 + %s1348_s26]]  ;;  %p1269_p10 = scmp.ge.s32.totalorder %s1272_s30, 8  }
 0x499   : > { %v1298_v25 = vstv %s1297_s10  ;;  %s1403_s27 = sld [smem:[#allocation9 + %s1348_s26]]  ;;  %1548 = vmatprep.mubr.f32.mxu1 (%p1269_p10), %v2482_v6  ;;  %vm1432_vm6 = vcmask (%p1269_p10), 261120   ;;  %v1450_v6 = vmul.f32 (%p1269_p10), 1.442695, %v3791_v52 }
 0x49a   : > { %v1294_v26 = vstv %s1293_s11  ;;  %s1399_s29 = sld [smem:[#allocation7 + %s1383_s28]] }
 0x49b   : > { %v1330_v31 = vstv %s1329_s6 }
 0x49c   : > { %v1334_v32 = vstv %s1333_s3 }
 0x49d   : > { %v2397_v10 = vpop.eup %2396  ;;  %v1369_v49 = vstv %s1368_s5 }
 0x49e   : > { %v1304_v11 = vmul.f32 %v2397_v10, %v1303_v9  ;;  %v1299_v27 = vmul.f32 %v2397_v10, %v1298_v25  ;;  %v1312_v47 = vsel %vm1311_vm2, %v2397_v10, %v2466_v7  ;;  %v1365_v8 = vstv %s1364_s4 }
 0x49f   :  { %v1444_v25 = vmul.f32 (%p1269_p10), %v3791_v52, %v3791_v52 }
 0x4a0   : > { %1306 = vrot.lane.b32.xlu1 %v1304_v11, %s2485_s16 }
 0x4a4   : > { %1318 = vrot.lane.b32.xlu1 %v2214_v12, %s2485_s16  ;;  %v1415_v12 = vstv %s1348_s26 }
 0x4a5   : > { %vm1416_vm5 = vcmp.eq.s32.totalorder %v3594_v15, %v1415_v12 }
 0x505   : > { %v1283_v13 = vpop.permute.xlu0 %1282 }
 0x506   : > { %v1285_v14 = vmul.f32 %v2474_v62, %v1283_v13  ;;  %v2229_v13 = vld [vmem:[%s3830_s2 + $0x18] sm:$0xff] }
 0x508   : > { %1287 = vrot.lane.b32.xlu0 %v1285_v14, %s2486_s23  ;;  %v1404_v14 = vstv %s1403_s27 }
 0x512   : > { %v1307_v16 = vpop.permute.xlu1 %1306 }
 0x513   : > { %v1309_v17 = vadd.f32 %v2474_v62, %v1307_v16 }
 0x516   : > { %v1319_v18 = vpop.permute.xlu1 %1318 }
 0x517   : > { %v1321_v19 = vmul.f32 %v1319_v18, %v1309_v17 }
 0x519   : > { %1323 = vrot.lane.b32.xlu1 %v1321_v19, %s2486_s23 }
 0x57a   : > { %v1288_v20 = vpop.permute.xlu0 %1287 }
 0x57b   : > { %v1290_v21 = vsel %vm1260_vm1, %v1288_v20, 0.0  ;;  %v1400_v20 = vstv %s1399_s29 }
 0x57c   : > { %1291 = vadd.xlane.f32.xlu0 %v1290_v21 }
 0x58b   : > { %v1324_v22 = vpop.permute.xlu1 %1323 }
 0x58c   : > { %v1326_v23 = vsel %vm1260_vm1, %v1324_v22, 0.0 }
 0x58d   : > { %1327 = vadd.xlane.f32.xlu1 %v1326_v23 }
 0x59e   : > { %1353 = vrot.lane.b32.xlu1 %v2220_v24, %s2485_s16 }
 0x5a2   : > { %1388 = vrot.lane.b32.xlu1 %v2226_v34, %s2485_s16 }
 0x605   : > { %v1292_v28 = vpop.xlane.xlu0 %1291 }
 0x606   : > { %v1295_v29 = vadd.f32 %v1294_v26, %v1292_v28  ;;  %v1466_v26 = vld [vmem:[%s3955_s13 + $0x8] sm:$0xff] (%p1269_p10) }
 0x607   :  { %1514 = vmatprep.subr.mxu1 (%p1269_p10), %v1466_v26 }
 0x608   : > { %v1300_v30 = vadd.f32 %v1299_v27, %v1295_v29  ;;  %v1465_v27 = vld [vmem:[%s3955_s13] sm:$0xff] (%p1269_p10) }
 0x609   :  { %v2230_v29 = vld [vmem:[%s3954_s12] ss:$0 sm:$0xff] (%p1269_p10)  ;;  %1515 = vmatpush1.msra.mxu1 (%p1269_p10), %v1465_v27 }
 0x60a   : > { %2398 = vtanh.f32 %v1300_v30 }
 0x616   : > { %v1328_v35 = vpop.xlane.xlu1 %1327 }
 0x617   : > { %v2399_v36 = vpop.eup %2398  ;;  %v1331_v37 = vadd.f32 %v1330_v31, %v1328_v35 }
 0x618   : > { %v1335_v38 = vmul.f32 %v2399_v36, %v1334_v32  ;;  %v1339_v39 = vmul.f32 %v2399_v36, %v2217_v33  ;;  %v1347_v51 = vsel %vm1346_vm3, %v2399_v36, %v1312_v47 }
 0x61a   : > { %v1336_v40 = vadd.f32 %v1335_v38, %v1331_v37  ;;  %1341 = vrot.lane.b32.xlu0 %v1339_v39, %s2485_s16  ;;  %v1354_v56 = vpop.permute.xlu1 %1353  ;;  %v1443_v38 = vadd.f32 (%p1269_p10), 1.0, %v3791_v52 }
 0x61c   : > { %2400 = vtanh.f32 %v1336_v40 }
 0x61e   : > { %v1389_v2 = vpop.permute.xlu1 %1388 }
 0x629   : > { %v2401_v50 = vpop.eup %2400 }
 0x62a   : > { %v1382_v53 = vsel %vm3862_vm4, %v2401_v50, %v1347_v51  ;;  %v1370_v54 = vmul.f32 %v2401_v50, %v1369_v49  ;;  %v1374_v62 = vmul.f32 %v2401_v50, %v2223_v61 }
 0x68c   : > { %v1342_v55 = vpop.permute.xlu0 %1341 }
 0x68d   : > { %v1344_v58 = vadd.f32 %v1342_v55, %v1309_v17 }
 0x68f   : > { %v1356_v60 = vmul.f32 %v1354_v56, %v1344_v58 }
 0x691   : > { %1358 = vrot.lane.b32.xlu0 %v1356_v60, %s2486_s23 }
 0x695   : > { %1376 = vrot.lane.b32.xlu0 %v1374_v62, %s2485_s16 }
 0x703   : > { %v1359_v63 = vpop.permute.xlu0 %1358 }
 0x704   : > { %v1361_v0 = vsel %vm1260_vm1, %v1359_v63, 0.0  ;;  %v1467_v63 = vld [vmem:[%s3956_s14] sm:$0x3] (%p1269_p10) }
 0x705   : > { %1362 = vadd.xlane.f32.xlu0 %v1361_v0  ;;  %v1472_v0 = vrot.slane (%p1269_p10), %v1467_v63, %v3674_v42 }
 0x707   : > { %v1377_v1 = vpop.permute.xlu0 %1376 }
 0x708   : > { %v1379_v3 = vadd.f32 %v1377_v1, %v1344_v58  ;;  %v1476_v1 = vrot.slane (%p1269_p10), %v1467_v63, %v3680_v44 }
 0x70a   : > { %v1391_v4 = vmul.f32 %v1389_v2, %v1379_v3 }
 0x70c   : > { %1393 = vrot.lane.b32.xlu1 %v1391_v4, %s2486_s23 }
 0x77e   : > { %v1394_v5 = vpop.permute.xlu1 %1393 }
 0x77f   : > { %v1396_v7 = vsel %vm1260_vm1, %v1394_v5, 0.0 }
 0x780   : > { %1397 = vadd.xlane.f32.xlu1 %v1396_v7 }
 0x78e   : > { %v1363_v9 = vpop.xlane.xlu0 %1362 }
 0x78f   : > { %v1366_v10 = vadd.f32 %v1365_v8, %v1363_v9 }
 0x791   : > { %v1371_v11 = vadd.f32 %v1370_v54, %v1366_v10 }
 0x793   : > { %2402 = vtanh.f32 %v1371_v11 }
 0x7a0   : > { %v2403_v16 = vpop.eup %2402 }
 0x7a1   : > { %v1417_v17 = vsel %vm1416_vm5, %v2403_v16, %v1382_v53   ;;  %v1409_v18 = vmul.f32 %v2403_v16, %v2229_v13  ;;  %v1405_v19 = vmul.f32 %v2403_v16, %v1404_v14 }
 0x7a2   : > { %v3973_v7 = vmov %v1417_v17  ;;  %v1418_v28 = vmul.f32 (%p1269_p10), %v1417_v17, %v1417_v17 }
 0x7a3   : > { %1411 = vrot.lane.b32.xlu0 %v1409_v18, %s2485_s16 }
 0x7a4   :  { %v1419_v30 = vsub.f32 (%p1269_p10), 1.0, %v1418_v28 }
 0x7a6   :  { %v1427_v31 = vmul.f32 (%p1269_p10), %v2230_v29, %v1419_v30 }
 0x7a8   :  { %v1428_v32 = vadd.f32 (%p1269_p10), 1.0, %v1427_v31 }
 0x7aa   :  { %v1429_v33 = vand.u32 (%p1269_p10), 2147483647, %v1428_v32 }
 0x7ac   :  { %2404 = vlog2.f32 (%p1269_p10), %v1429_v33 }
 0x7ad   :  { %2406 = vpow2.f32 (%p1269_p10), %v1450_v6 }
 0x7b9   :  { %v2405_v34 = vpop.eup (%p1269_p10), %2404 }
 0x7ba   :  { %v1431_v35 = vmul.f32 (%p1269_p10), 0.6931472, %v2405_v34  ;;  %v2407_v39 = vpop.eup (%p1269_p10), %2406 }
 0x7bc   :  { %v1433_v36 = vsel (%p1269_p10), %vm1432_vm6, %v1431_v35, 0.0 }
 0x7bd   :  { %1434 = vadd.xlane.f32.xlu1 (%p1269_p10), %v1433_v36 }
 0x809   : > { %v1398_v21 = vpop.xlane.xlu1 %1397 }
 0x80a   : > { %v1401_v22 = vadd.f32 %v1400_v20, %v1398_v21 }
 0x80c   : > { %v1406_v5 = vadd.f32 %v1405_v19, %v1401_v22  }
 0x814   :  { %1271 = sbr.rel (!%p1269_p10) target bundleno = 1168 (0x490), region = 273 }
 0x815   : > { %v1412_v23 = vpop.permute.xlu0 %1411 }
 0x816   : > { %v1414_v24 = vadd.f32 %v1412_v23, %v1379_v3  }
 0x818   : > { %v3974_v62 = vmov %v1414_v24  ;;  %1480 = vrot.lane.b32.xlu0 (%p1269_p10), %v1414_v24, %s2484_s7 }
 0x81c   :  { %1446 = vrot.lane.b32.xlu0 %v1444_v25, %s2484_s7 }
 0x846   :  { %v1435_v47 = vpop.xlane.xlu1 %1434 }
 0x847   :  { %v1436_v48 = vrot.slane %v1435_v47, 4 }
 0x849   :  { %v1437_v49 = vadd.f32 %v1436_v48, %v1435_v47 }
 0x84b   :  { %v1438_v50 = vrot.slane %v1437_v49, 2 }
 0x84d   :  { %v1439_v51 = vadd.f32 %v1438_v50, %v1437_v49 }
 0x84f   :  { %v1440_v53 = vrot.slane %v1439_v51, 1 }
 0x851   :  { %v1441_v54 = vadd.f32 %v1440_v53, %v1439_v51 }
 0x853   :  { %2351 = vpush %v1441_v54 }
 0x884   :  { %s2352_s12 = spop %2351 }
 0x88a   :  { %v1481_v37 = vpop.permute.xlu0 %1480 }
 0x88b   :  { %2231 = vmatmul.mubr.msk.f32.vlgmr.msra.gmra.mxu1 %vm1260_vm1, %v1481_v37 }
 0x88e   :  { %v1447_v40 = vpop.permute.xlu0 %1446 }
 0x88f   :  { %v1449_v43 = vsub.f32 %v1443_v38, %v1447_v40 }
 0x891   :  { %v1452_v45 = vsub.f32 %v1449_v43, %v2407_v39 }
 0x893   :  { %v1453_v46 = vsel %vm1260_vm1, %v1452_v45, 0.0 }
 0x894   :  { %1454 = vadd.xlane.f32.xlu1 %v1453_v46 }
 0x91d   :  { %v1455_v55 = vpop.xlane.xlu1 %1454 }
 0x91e   :  { %v1456_v56 = vrot.slane %v1455_v55, 4 }
 0x920   :  { %v1457_v58 = vadd.f32 %v1456_v56, %v1455_v55 }
 0x922   :  { %v1458_v60 = vrot.slane %v1457_v58, 2 }
 0x924   :  { %v1459_v52 = vadd.f32 %v1458_v60, %v1457_v58 }
 0x926   :  { %v1460_v61 = vrot.slane %v1459_v52, 1 }
 0x928   :  { %v1461_v62 = vadd.f32 %v1460_v61, %v1459_v52 }
 0x92a   :  { %2353 = vpush %v1461_v62 }
 0x94b   :  { %v1550_v2 = vpop.f32.mrf.mxu1 }
 0x94c   :  { %v3911_v3 = vadd.f32 %v1550_v2, %v1472_v0 }
 0x94d   :  { %v1552_v4 = vpop.f32.mrf.mxu1 }
 0x94e   :  { %v1555_v5 = vmax.f32 %v3911_v3, 0.0  ;;  %v1553_v7 = vadd.f32 %v1552_v4, %v1476_v1 }
 0x950   :  { %v1556_v8 = vmax.f32 %v1553_v7, 0.0 }
 0x95b   :  { %s2354_s13 = spop %2353 }
 0x95c   :  { %s1463_s7 = smul.f32 -0.5, %s2354_s13 }
 0x95e   :  { %s3914_s16 = ssub.f32 %s1463_s7, %s2352_s12 }
 0x95f   :  { %2456 = dma.done.wait [#allocation6], 16384 }
 0x960   :  { %2457 = vsyncadd [#allocation6], 4294950912 }
 0x961   :  { %2458 = dma.done.wait [#allocation6 + $0x2], 64 }
 0x962   :  { %2459 = vsyncadd [#allocation6 + $0x2], 4294967232  ;;  %1778 = vmatprep.mubr.f32.mxu1 %v1556_v8  ;;  %1849 = vmatprep.mubr.f32.mxu0 %v1556_v8  ;;  %v1625_v9 = vld [vmem:[#allocation2 + $0x30] sm:$0xff]  ;;  %v1627_v10 = vld [vmem:[#allocation2 + $0x2a8] sm:$0xff] }
 0x963   :  { %v1624_v11 = vld [vmem:[#allocation2 + $0x1d8] sm:$0xff]  ;;  %1714 = vmatprep.subr.mxu1 %v1625_v9  ;;  %1785 = vmatprep.subr.mxu0 %v1627_v10  ;;  %v1626_v12 = vld [vmem:[#allocation2 + $0x140] sm:$0xff]  ;;  %v1621_v13 = vld [vmem:[#allocation2 + $0x268] sm:$0xff] }
 0x964   :  { %v1623_v14 = vld [vmem:[#allocation2 + $0x188] sm:$0xff]  ;;  %1715 = vmatpush1.msra.mxu1 %v1624_v11  ;;  %1786 = vmatpush1.msra.mxu0 %v1626_v12  ;;  %v1620_v16 = vld [vmem:[#allocation2 + $0x358] sm:$0xff]  ;;  %v1622_v17 = vld [vmem:[#allocation2 + $0x350] sm:$0xff] }
 0x965   :  { %v1617_v18 = vld [vmem:[#allocation2 + $0xd0] sm:$0xff]  ;;  %1716 = vmatprep.subr.mxu1 %v1621_v13  ;;  %1787 = vmatprep.subr.mxu0 %v1623_v14  ;;  %v1616_v20 = vld [vmem:[#allocation2 + $0x208] sm:$0xff]  ;;  %v1613_v22 = vld [vmem:[#allocation2 + $0x240] sm:$0xff] }
 0x966   :  { %v1619_v19 = vld [vmem:[#allocation2 + $0x2f0] sm:$0xff]  ;;  %v1618_v21 = vld [vmem:[#allocation2 + $0x88] sm:$0xff]  ;;  %1717 = vmatpush1.msra.mxu1 %v1620_v16  ;;  %1788 = vmatpush1.msra.mxu0 %v1622_v17  ;;  %v1615_v23 = vld [vmem:[#allocation2 + $0x3a0] sm:$0xff] }
 0x967   :  { %1718 = vmatprep.subr.mxu1 %v1617_v18  ;;  %1789 = vmatprep.subr.mxu0 %v1619_v19  ;;  %v1612_v24 = vld [vmem:[#allocation2 + $0x230] sm:$0xff]  ;;  %v1609_v26 = vld [vmem:[#allocation2 + $0x1e0] sm:$0xff]  ;;  %v1601_v34 = vld [vmem:[#allocation2 + $0x3f8] sm:$0xff] }
 0x968   :  { %v1614_v25 = vld [vmem:[#allocation2 + $0x90] sm:$0xff]  ;;  %1719 = vmatpush1.msra.mxu1 %v1616_v20  ;;  %1790 = vmatpush1.msra.mxu0 %v1618_v21  ;;  %v1607_v31 = vld [vmem:[#allocation2 + $0x2c0] sm:$0xff]  ;;  %v1603_v35 = vld [vmem:[#allocation2 + $0x128] sm:$0xff] }
 0x969   :  { %v1611_v27 = vld [vmem:[#allocation2 + $0x10] sm:$0xff]  ;;  %1720 = vmatprep.subr.mxu1 %v1613_v22  ;;  %1791 = vmatprep.subr.mxu0 %v1615_v23  ;;  %v1604_v32 = vld [vmem:[#allocation2 + $0x2a0] sm:$0xff]  ;;  %v1600_v36 = vld [vmem:[#allocation2 + $0x218] sm:$0xff] }
 0x96a   :  { %v1608_v28 = vld [vmem:[#allocation2 + $0xb0] sm:$0xff]  ;;  %1721 = vmatpush1.msra.mxu1 %v1612_v24  ;;  %1792 = vmatpush1.msra.mxu0 %v1614_v25  ;;  %v1606_v33 = vld [vmem:[#allocation2 + $0xa0] sm:$0xff]  ;;  %v1602_v6 = vld [vmem:[#allocation2 + $0x8] sm:$0xff] }
 0x96b   :  { %v1610_v29 = vld [vmem:[#allocation2 + $0x1f0] sm:$0xff]  ;;  %1722 = vmatprep.subr.mxu1 %v1609_v26  ;;  %1793 = vmatprep.subr.mxu0 %v1611_v27  ;;  %v1597_v37 = vld [vmem:[#allocation2 + $0x3c0] sm:$0xff]  ;;  %v1598_v40 = vld [vmem:[#allocation2 + $0x158] sm:$0xff] }
 0x96c   :  { %v1605_v30 = vld [vmem:[#allocation2 + $0x3f0] sm:$0xff]  ;;  %1723 = vmatpush1.msra.mxu1 %v1608_v28  ;;  %1794 = vmatpush1.msra.mxu0 %v1610_v29  ;;  %v1599_v38 = vld [vmem:[#allocation2 + $0x3e0] sm:$0xff]  ;;  %v1592_v46 = vld [vmem:[#allocation2 + $0x138] sm:$0xff] }
 0x96d   :  { %1724 = vmatprep.subr.mxu1 %v1605_v30  ;;  %1795 = vmatprep.subr.mxu0 %v1607_v31  ;;  %v1596_v39 = vld [vmem:[#allocation2 + $0x100] sm:$0xff]  ;;  %v1589_v48 = vld [vmem:[#allocation2 + $0x2f8] sm:$0xff]  ;;  %v1591_v49 = vld [vmem:[#allocation2 + $0x28] sm:$0xff] }
 0x96e   :  { %1725 = vmatpush1.msra.mxu1 %v1604_v32  ;;  %1796 = vmatpush1.msra.mxu0 %v1606_v33  ;;  %v1593_v43 = vld [vmem:[#allocation2 + $0xc0] sm:$0xff]  ;;  %v1588_v50 = vld [vmem:[#allocation2 + $0x3e8] sm:$0xff]  ;;  %v1590_v51 = vld [vmem:[#allocation2 + $0x290] sm:$0xff] }
 0x96f   :  { %1726 = vmatprep.subr.mxu1 %v1601_v34  ;;  %1797 = vmatprep.subr.mxu0 %v1603_v35  ;;  %v1595_v45 = vld [vmem:[#allocation2 + $0x280] sm:$0xff]  ;;  %v1585_v53 = vld [vmem:[#allocation2 + $0x1a8] sm:$0xff]  ;;  %v1586_v56 = vld [vmem:[#allocation2 + $0x1b8] sm:$0xff] }
 0x970   :  { %1727 = vmatpush1.msra.mxu1 %v1600_v36  ;;  %1798 = vmatpush1.msra.mxu0 %v1602_v6  ;;  %v1594_v47 = vld [vmem:[#allocation2 + $0x1c0] sm:$0xff]  ;;  %v1587_v54 = vld [vmem:[#allocation2 + $0x168] sm:$0xff]  ;;  %v1582_v61 = vld [vmem:[#allocation2 + $0x338] sm:$0xff] }
 0x971   :  { %1728 = vmatprep.subr.mxu1 %v1597_v37  ;;  %1799 = vmatprep.subr.mxu0 %v1599_v38  ;;  %v1584_v55 = vld [vmem:[#allocation2 + $0x80] sm:$0xff]  ;;  %v1581_v58 = vld [vmem:[#allocation2 + $0x388] sm:$0xff]  ;;  %v1577_v62 = vld [vmem:[#allocation2 + $0x150] sm:$0xff] }
 0x972   :  { %1729 = vmatpush1.msra.mxu1 %v1596_v39  ;;  %1800 = vmatpush1.msra.mxu0 %v1598_v40  ;;  %v1583_v60 = vld [vmem:[#allocation2 + $0x340] sm:$0xff]  ;;  %v1578_v1 = vld [vmem:[#allocation2 + $0x108] sm:$0xff]  ;;  %v1573_v2 = vld [vmem:[#allocation2 + $0x110] sm:$0xff] }
 0x973   :  { %1730 = vmatprep.subr.mxu1 %v1593_v43  ;;  %1801 = vmatprep.subr.mxu0 %v1595_v45  ;;  %v1580_v52 = vld [vmem:[#allocation2 + $0x2e0] sm:$0xff]  ;;  %v1575_v4 = vld [vmem:[#allocation2 + $0x98] sm:$0xff]  ;;  %v1569_v9 = vld [vmem:[#allocation2 + $0x368] sm:$0xff] }
 0x974   :  { %1731 = vmatpush1.msra.mxu1 %v1592_v46  ;;  %1802 = vmatpush1.msra.mxu0 %v1594_v47  ;;  %v1579_v63 = vld [vmem:[#allocation2 + $0x60] sm:$0xff]  ;;  %v1574_v8 = vld [vmem:[#allocation2 + $0x118] sm:$0xff]  ;;  %v1571_v10 = vld [vmem:[#allocation2 + $0x48] sm:$0xff] }
 0x975   :  { %1732 = vmatprep.subr.mxu1 %v1589_v48  ;;  %1803 = vmatprep.subr.mxu0 %v1591_v49  ;;  %v1576_v0 = vld [vmem:[#allocation2 + $0x320] sm:$0xff]  ;;  %v1568_v11 = vld [vmem:[#allocation2 + $0x50] sm:$0xff]  ;;  %v1567_v14 = vld [vmem:[#allocation2 + $0x18] sm:$0xff] }
 0x976   :  { %1733 = vmatpush1.msra.mxu1 %v1588_v50  ;;  %1804 = vmatpush1.msra.mxu0 %v1590_v51  ;;  %v1572_v7 = vld [vmem:[#allocation2 + $0x380] sm:$0xff]  ;;  %v1570_v12 = vld [vmem:[#allocation2 + $0x330] sm:$0xff]  ;;  %v1566_v17 = vld [vmem:[#allocation2 + $0xd8] sm:$0xff] }
 0x977   :  { %1734 = vmatprep.subr.mxu1 %v1585_v53  ;;  %1805 = vmatprep.subr.mxu0 %v1587_v54  ;;  %v1565_v13 = vld [vmem:[#allocation2 + $0x3b0] sm:$0xff]  ;;  %v1688_v20 = vld [vmem:[#allocation2 + $0x298] sm:$0xff]  ;;  %v1687_v23 = vld [vmem:[#allocation2] sm:$0xff] }
 0x978   :  { %1735 = vmatpush1.msra.mxu1 %v1584_v55  ;;  %1806 = vmatpush1.msra.mxu0 %v1586_v56  ;;  %v1564_v16 = vld [vmem:[#allocation2 + $0x2b0] sm:$0xff]  ;;  %v1685_v22 = vld [vmem:[#allocation2 + $0xf8] sm:$0xff]  ;;  %v1684_v24 = vld [vmem:[#allocation2 + $0x148] sm:$0xff] }
 0x979   :  { %1736 = vmatprep.subr.mxu1 %v1581_v58  ;;  %1807 = vmatprep.subr.mxu0 %v1583_v60  ;;  %v1689_v18 = vld [vmem:[#allocation2 + $0x270] sm:$0xff]  ;;  %v1686_v25 = vld [vmem:[#allocation2 + $0x68] sm:$0xff]  ;;  %v1681_v26 = vld [vmem:[#allocation2 + $0x360] sm:$0xff] }
 0x97a   :  { %1737 = vmatpush1.msra.mxu1 %v1580_v52  ;;  %1808 = vmatpush1.msra.mxu0 %v1582_v61  ;;  %v1691_v19 = vld [vmem:[#allocation2 + $0x190] sm:$0xff]  ;;  %v1683_v27 = vld [vmem:[#allocation2 + $0x348] sm:$0xff]  ;;  %v1680_v28 = vld [vmem:[#allocation2 + $0x278] sm:$0xff] }
 0x97b   :  { %1738 = vmatprep.subr.mxu1 %v1577_v62  ;;  %1809 = vmatprep.subr.mxu0 %v1579_v63  ;;  %v1690_v21 = vld [vmem:[#allocation2 + $0x310] sm:$0xff]  ;;  %v1682_v29 = vld [vmem:[#allocation2 + $0x228] sm:$0xff]  ;;  %v1676_v32 = vld [vmem:[#allocation2 + $0x78] sm:$0xff] }
 0x97c   :  { %1739 = vmatpush1.msra.mxu1 %v1576_v0  ;;  %1810 = vmatpush1.msra.mxu0 %v1578_v1  ;;  %v1677_v30 = vld [vmem:[#allocation2 + $0x308] sm:$0xff]  ;;  %v1678_v33 = vld [vmem:[#allocation2 + $0x370] sm:$0xff]  ;;  %v1673_v34 = vld [vmem:[#allocation2 + $0x378] sm:$0xff] }
 0x97d   :  { %1740 = vmatprep.subr.mxu1 %v1573_v2  ;;  %1811 = vmatprep.subr.mxu0 %v1575_v4  ;;  %v1679_v31 = vld [vmem:[#allocation2 + $0xc8] sm:$0xff]  ;;  %v1675_v35 = vld [vmem:[#allocation2 + $0x38] sm:$0xff]  ;;  %v1672_v36 = vld [vmem:[#allocation2 + $0x250] sm:$0xff] }
 0x97e   :  { %1741 = vmatpush1.msra.mxu1 %v1572_v7  ;;  %1812 = vmatpush1.msra.mxu0 %v1574_v8  ;;  %v1674_v6 = vld [vmem:[#allocation2 + $0xb8] sm:$0xff]  ;;  %v1669_v37 = vld [vmem:[#allocation2 + $0x180] sm:$0xff]  ;;  %v1671_v38 = vld [vmem:[#allocation2 + $0x3d0] sm:$0xff] }
 0x97f   :  { %1742 = vmatprep.subr.mxu1 %v1569_v9  ;;  %1813 = vmatprep.subr.mxu0 %v1571_v10  ;;  %v1668_v39 = vld [vmem:[#allocation2 + $0xf0] sm:$0xff]  ;;  %v1665_v43 = vld [vmem:[#allocation2 + $0xa8] sm:$0xff]  ;;  %v1667_v45 = vld [vmem:[#allocation2 + $0x2d8] sm:$0xff] }
 0x980   :  { %1743 = vmatpush1.msra.mxu1 %v1568_v11  ;;  %1814 = vmatpush1.msra.mxu0 %v1570_v12  ;;  %v1670_v40 = vld [vmem:[#allocation2 + $0x170] sm:$0xff]  ;;  %v1664_v46 = vld [vmem:[#allocation2 + $0x1a0] sm:$0xff]  ;;  %v1666_v47 = vld [vmem:[#allocation2 + $0x258] sm:$0xff] }
 0x981   :  { %1744 = vmatprep.subr.mxu1 %v1565_v13  ;;  %1815 = vmatprep.subr.mxu0 %v1567_v14  ;;  %v1661_v48 = vld [vmem:[#allocation2 + $0x238] sm:$0xff]  ;;  %v1663_v49 = vld [vmem:[#allocation2 + $0x390] sm:$0xff]  ;;  %v1657_v53 = vld [vmem:[#allocation2 + $0x120] sm:$0xff] }
 0x982   :  { %1745 = vmatpush1.msra.mxu1 %v1564_v16  ;;  %1816 = vmatpush1.msra.mxu0 %v1566_v17  ;;  %v1660_v50 = vld [vmem:[#allocation2 + $0x1f8] sm:$0xff]  ;;  %v1659_v54 = vld [vmem:[#allocation2 + $0x2e8] sm:$0xff]  ;;  %v1655_v60 = vld [vmem:[#allocation2 + $0x1d0] sm:$0xff] }
 0x983   :  { %1746 = vmatprep.subr.mxu1 %v1689_v18  ;;  %1817 = vmatprep.subr.mxu0 %v1691_v19  ;;  %v1662_v51 = vld [vmem:[#allocation2 + $0x398] sm:$0xff]  ;;  %v1653_v58 = vld [vmem:[#allocation2 + $0x1c8] sm:$0xff]  ;;  %v1652_v52 = vld [vmem:[#allocation2 + $0x1b0] sm:$0xff] }
 0x984   :  { %1747 = vmatpush2.msra.mxu1 %v1688_v20  ;;  %1818 = vmatpush2.msra.mxu0 %v1690_v21  ;;  %v1656_v55 = vld [vmem:[#allocation2 + $0x58] sm:$0xff]  ;;  %v1654_v61 = vld [vmem:[#allocation2 + $0x2d0] sm:$0xff]  ;;  %v1651_v63 = vld [vmem:[#allocation2 + $0x1e8] sm:$0xff] }
 0x985   :  { %1748 = vmatprep.subr.mxu1 %v1685_v22  ;;  %1819 = vmatprep.subr.mxu0 %v1687_v23  ;;  %v1658_v56 = vld [vmem:[#allocation2 + $0x198] sm:$0xff]  ;;  %v1649_v62 = vld [vmem:[#allocation2 + $0x210] sm:$0xff]  ;;  %v1648_v0 = vld [vmem:[#allocation2 + $0x2c8] sm:$0xff] }
 0x986   :  { %1749 = vmatpush2.msra.mxu1 %v1684_v24  ;;  %1820 = vmatpush2.msra.mxu0 %v1686_v25  ;;  %v1650_v1 = vld [vmem:[#allocation2 + $0x3d8] sm:$0xff]  ;;  %v1645_v2 = vld [vmem:[#allocation2 + $0x3a8] sm:$0xff]  ;;  %v1647_v4 = vld [vmem:[#allocation2 + $0x160] sm:$0xff] }
 0x987   :  { %1750 = vmatprep.subr.mxu1 %v1681_v26  ;;  %1821 = vmatprep.subr.mxu0 %v1683_v27  ;;  %v1644_v7 = vld [vmem:[#allocation2 + $0x288] sm:$0xff]  ;;  %v1641_v9 = vld [vmem:[#allocation2 + $0x40] sm:$0xff]  ;;  %v1639_v14 = vld [vmem:[#allocation2 + $0x2b8] sm:$0xff] }
 0x988   :  { %1751 = vmatpush2.msra.mxu1 %v1680_v28  ;;  %1822 = vmatpush2.msra.mxu0 %v1682_v29  ;;  %v1646_v8 = vld [vmem:[#allocation2 + $0x3c8] sm:$0xff]  ;;  %v1642_v12 = vld [vmem:[#allocation2 + $0x20] sm:$0xff]  ;;  %v1638_v17 = vld [vmem:[#allocation2 + $0x3b8] sm:$0xff] }
 0x989   :  { %1752 = vmatprep.subr.mxu1 %v1677_v30  ;;  %1823 = vmatprep.subr.mxu0 %v1679_v31  ;;  %v1643_v10 = vld [vmem:[#allocation2 + $0xe8] sm:$0xff]  ;;  %v1637_v13 = vld [vmem:[#allocation2 + $0x260] sm:$0xff]  ;;  %v1635_v19 = vld [vmem:[#allocation2 + $0x178] sm:$0xff] }
 0x98a   :  { %1753 = vmatpush2.msra.mxu1 %v1676_v32  ;;  %1824 = vmatpush2.msra.mxu0 %v1678_v33  ;;  %v1640_v11 = vld [vmem:[#allocation2 + $0x248] sm:$0xff]  ;;  %v1633_v18 = vld [vmem:[#allocation2 + $0x300] sm:$0xff]  ;;  %v1632_v20 = vld [vmem:[#allocation2 + $0x70] sm:$0xff] }
 0x98b   :  { %1754 = vmatprep.subr.mxu1 %v1673_v34  ;;  %1825 = vmatprep.subr.mxu0 %v1675_v35  ;;  %v1636_v16 = vld [vmem:[#allocation2 + $0x328] sm:$0xff]  ;;  %v1634_v21 = vld [vmem:[#allocation2 + $0xe0] sm:$0xff]  ;;  %v1628_v24 = vld [vmem:[#allocation2 + $0x130] sm:$0xff] }
 0x98c   :  { %1755 = vmatpush2.msra.mxu1 %v1672_v36  ;;  %1826 = vmatpush2.msra.mxu0 %v1674_v6  ;;  %v1629_v22 = vld [vmem:[#allocation2 + $0x200] sm:$0xff]  ;;  %v1630_v25 = vld [vmem:[#allocation2 + $0x318] sm:$0xff] }
 0x98d   :  { %1756 = vmatprep.subr.mxu1 %v1669_v37  ;;  %1827 = vmatprep.subr.mxu0 %v1671_v38  ;;  %v1631_v23 = vld [vmem:[#allocation2 + $0x220] sm:$0xff] }
 0x98e   :  { %1757 = vmatpush2.msra.mxu1 %v1668_v39  ;;  %1828 = vmatpush2.msra.mxu0 %v1670_v40  ;;  %v1692_v26 = vld [vmem:[#allocation3] sm:$0xf] }
 0x98f   :  { %1758 = vmatprep.subr.mxu1 %v1665_v43  ;;  %1829 = vmatprep.subr.mxu0 %v1667_v45  ;;  %v1697_v27 = vrot.slane %v1692_v26, %v3674_v42  ;;  %v1705_v28 = vrot.slane %v1692_v26, %v685_v57  ;;  %v1701_v29 = vrot.slane %v1692_v26, %v3680_v44 }
 0x990   :  { %1759 = vmatpush2.msra.mxu1 %v1664_v46  ;;  %1830 = vmatpush2.msra.mxu0 %v1666_v47  ;;  %v1709_v30 = vrot.slane %v1692_v26, %v689_v59 }
 0x991   :  { %1760 = vmatprep.subr.mxu1 %v1661_v48  ;;  %1831 = vmatprep.subr.mxu0 %v1663_v49 }
 0x992   :  { %1761 = vmatpush2.msra.mxu1 %v1660_v50  ;;  %1832 = vmatpush2.msra.mxu0 %v1662_v51 }
 0x993   :  { %1762 = vmatprep.subr.mxu1 %v1657_v53  ;;  %1833 = vmatprep.subr.mxu0 %v1659_v54 }
 0x994   :  { %1763 = vmatpush2.msra.mxu1 %v1656_v55  ;;  %1834 = vmatpush2.msra.mxu0 %v1658_v56 }
 0x995   :  { %1764 = vmatprep.subr.mxu1 %v1653_v58  ;;  %1835 = vmatprep.subr.mxu0 %v1655_v60 }
 0x996   :  { %1765 = vmatpush2.msra.mxu1 %v1652_v52  ;;  %1836 = vmatpush2.msra.mxu0 %v1654_v61 }
 0x997   :  { %1766 = vmatprep.subr.mxu1 %v1649_v62  ;;  %1837 = vmatprep.subr.mxu0 %v1651_v63 }
 0x998   :  { %1767 = vmatpush2.msra.mxu1 %v1648_v0  ;;  %1838 = vmatpush2.msra.mxu0 %v1650_v1 }
 0x999   :  { %1768 = vmatprep.subr.mxu1 %v1645_v2  ;;  %1839 = vmatprep.subr.mxu0 %v1647_v4 }
 0x99a   :  { %1769 = vmatpush2.msra.mxu1 %v1644_v7  ;;  %1840 = vmatpush2.msra.mxu0 %v1646_v8 }
 0x99b   :  { %1770 = vmatprep.subr.mxu1 %v1641_v9  ;;  %1841 = vmatprep.subr.mxu0 %v1643_v10 }
 0x99c   :  { %1771 = vmatpush2.msra.mxu1 %v1640_v11  ;;  %1842 = vmatpush2.msra.mxu0 %v1642_v12 }
 0x99d   :  { %1772 = vmatprep.subr.mxu1 %v1637_v13  ;;  %1843 = vmatprep.subr.mxu0 %v1639_v14 }
 0x99e   :  { %1773 = vmatpush2.msra.mxu1 %v1636_v16  ;;  %1844 = vmatpush2.msra.mxu0 %v1638_v17 }
 0x99f   :  { %1774 = vmatprep.subr.mxu1 %v1633_v18  ;;  %1845 = vmatprep.subr.mxu0 %v1635_v19 }
 0x9a0   :  { %1775 = vmatpush2.msra.mxu1 %v1632_v20  ;;  %1846 = vmatpush2.msra.mxu0 %v1634_v21 }
 0x9a1   :  { %1776 = vmatprep.subr.mxu1 %v1629_v22  ;;  %1847 = vmatprep.subr.mxu0 %v1631_v23 }
 0x9a2   :  { %1777 = vmatpush2.msra.mxu1 %v1628_v24  ;;  %1848 = vmatpush2.msra.mxu0 %v1630_v25 }
 0x9a3   :  { %1779 = vmatmul.mubr.f32.vlgmr.msra.gmra.mxu1 %v1555_v5  ;;  %1850 = vmatmul.mubr.f32.vlgmr.msra.gmra.mxu0 %v1555_v5 }
 0xa63   :  { %v1780_v31 = vpop.f32.mrf.mxu1  ;;  %v1851_v32 = vpop.f32.mrf.mxu0 }
 0xa64   :  { %v3926_v33 = vadd.f32 %v1780_v31, %v1697_v27  ;;  %v3928_v34 = vadd.f32 %v1851_v32, %v1705_v28 }
 0xa65   :  { %v1782_v35 = vpop.f32.mrf.mxu1  ;;  %v1853_v3 = vpop.f32.mrf.mxu0 }
 0xa66   :  { %v1856_v5 = vmax.f32 %v3926_v33, 0.0  ;;  %v1858_v42 = vmax.f32 %v3928_v34, 0.0  ;;  %v1783_v36 = vadd.f32 %v1782_v35, %v1701_v29  ;;  %v1854_v6 = vadd.f32 %v1853_v3, %v1709_v30 }
 0xa68   :  { %v1857_v57 = vmax.f32 %v1783_v36, 0.0  ;;  %v1859_v37 = vmax.f32 %v1854_v6, 0.0 }
 0xa69   :  { %2460 = dma.done.wait [#allocation6 + $0x1], 8192 }
 0xa6a   :  { %2461 = vsyncadd [#allocation6 + $0x1], 4294959104 }
 0xa6b   :  { %2462 = dma.done.wait [#allocation6 + $0x3], 16 }
 0xa6c   :  { %2463 = vsyncadd [#allocation6 + $0x3], 4294967280  ;;  %2001 = vmatprep.mubr.f32.mxu1 %v1857_v57  ;;  %2071 = vmatprep.mubr.f32.mxu0 %v1859_v37  ;;  %v1897_v44 = vld [vmem:[#allocation4 + $0x190] sm:$0xff]  ;;  %v1929_v59 = vld [vmem:[#allocation4 + $0x1f8] sm:$0xff]  ;;  %vm2085_vm7 = vcmp.eq.s32.totalorder %v3671_v41, 0  ;;  %vm2086_vm8 = vcmp.eq.s32.totalorder %v3594_v15, 64  ;;  %v2088_v33 = vstv %s3914_s16 }
 0xa6d   :  { %v1881_v38 = vld [vmem:[#allocation4 + $0x138] sm:$0xff]  ;;  %2281 = vmatprep.subr.mxu1 %v1897_v44  ;;  %2316 = vmatprep.subr.mxu0 %v1929_v59  ;;  %v1913_v39 = vld [vmem:[#allocation4 + $0x1f0] sm:$0xff]  ;;  %v1879_v49 = vld [vmem:[#allocation4 + $0x40] sm:$0xff] }
 0xa6e   :  { %v1896_v40 = vld [vmem:[#allocation4 + $0x158] sm:$0xff]  ;;  %2282 = vmatpush3.msra.mxu1 %v1881_v38  ;;  %2317 = vmatpush3.msra.mxu0 %v1913_v39  ;;  %v1927_v48 = vld [vmem:[#allocation4 + $0x1b0] sm:$0xff]  ;;  %v1894_v51 = vld [vmem:[#allocation4 + $0x68] sm:$0xff] }
 0xa6f   :  { %v1928_v43 = vld [vmem:[#allocation4 + $0xd8] sm:$0xff]  ;;  %2283 = vmatprep.subr.mxu1 %v1896_v40  ;;  %v1911_v50 = vld [vmem:[#allocation4 + $0xd0] sm:$0xff]  ;;  %v1878_v54 = vld [vmem:[#allocation4 + $0x1e8] sm:$0xff] }
 0xa70   :  { %v1880_v45 = vld [vmem:[#allocation4 + $0x178] sm:$0xff]  ;;  %2318 = vmatprep.subr.mxu0 %v1928_v43  ;;  %v1926_v53 = vld [vmem:[#allocation4 + $0x110] sm:$0xff]  ;;  %v1893_v56 = vld [vmem:[#allocation4 + $0x1a8] sm:$0xff] }
 0xa71   :  { %v1912_v46 = vld [vmem:[#allocation4 + $0x1b8] sm:$0xff]  ;;  %2284 = vmatpush3.msra.mxu1 %v1880_v45  ;;  %v1910_v55 = vld [vmem:[#allocation4 + $0x170] sm:$0xff]  ;;  %v1925_v58 = vld [vmem:[#allocation4 + $0x1e0] sm:$0xff] }
 0xa72   :  { %v1895_v47 = vld [vmem:[#allocation4 + $0x198] sm:$0xff]  ;;  %2319 = vmatpush3.msra.mxu0 %v1912_v46  ;;  %v1877_v60 = vld [vmem:[#allocation4 + $0x70] sm:$0xff]  ;;  %v1909_v52 = vld [vmem:[#allocation4 + $0xe8] sm:$0xff] }
 0xa73   :  { %2285 = vmatprep.subr.mxu1 %v1895_v47  ;;  %2320 = vmatprep.subr.mxu0 %v1927_v48  ;;  %v1892_v61 = vld [vmem:[#allocation4 + $0xa8] sm:$0xff]  ;;  %v1875_v4 = vld [vmem:[#allocation4 + $0x1d0] sm:$0xff]  ;;  %v1907_v7 = vld [vmem:[#allocation4 + $0x1a0] sm:$0xff] }
 0xa74   :  { %2286 = vmatpush3.msra.mxu1 %v1879_v49  ;;  %2321 = vmatpush3.msra.mxu0 %v1911_v50  ;;  %v1924_v62 = vld [vmem:[#allocation4 + $0x88] sm:$0xff]  ;;  %v1890_v8 = vld [vmem:[#allocation4 + $0x30] sm:$0xff]  ;;  %v1922_v9 = vld [vmem:[#allocation4 + $0x180] sm:$0xff] }
 0xa75   :  { %2287 = vmatprep.subr.mxu1 %v1894_v51  ;;  %2322 = vmatprep.subr.mxu0 %v1926_v53  ;;  %v1876_v63 = vld [vmem:[#allocation4 + $0x128] sm:$0xff]  ;;  %v1874_v10 = vld [vmem:[#allocation4 + $0x18] sm:$0xff]  ;;  %v1906_v11 = vld [vmem:[#allocation4 + $0xc0] sm:$0xff] }
 0xa76   :  { %2288 = vmatpush3.msra.mxu1 %v1878_v54  ;;  %2323 = vmatpush3.msra.mxu0 %v1910_v55  ;;  %v1908_v0 = vld [vmem:[#allocation4 + $0x1c8] sm:$0xff]  ;;  %v1889_v12 = vld [vmem:[#allocation4 + $0xa0] sm:$0xff]  ;;  %v1921_v13 = vld [vmem:[#allocation4 + $0x150] sm:$0xff] }
 0xa77   :  { %2289 = vmatprep.subr.mxu1 %v1893_v56  ;;  %2324 = vmatprep.subr.mxu0 %v1925_v58  ;;  %v1891_v1 = vld [vmem:[#allocation4 + $0x148] sm:$0xff]  ;;  %v1873_v14 = vld [vmem:[#allocation4 + $0x20] sm:$0xff]  ;;  %v1888_v17 = vld [vmem:[#allocation4 + $0x118] sm:$0xff] }
 0xa78   :  { %2290 = vmatpush3.msra.mxu1 %v1877_v60  ;;  %2325 = vmatpush3.msra.mxu0 %v1909_v52  ;;  %v1923_v2 = vld [vmem:[#allocation4 + $0x188] sm:$0xff]  ;;  %v1905_v16 = vld [vmem:[#allocation4 + $0x60] sm:$0xff]  ;;  %v1920_v18 = vld [vmem:[#allocation4 + $0x98] sm:$0xff] }
 0xa79   :  { %2291 = vmatprep.subr.mxu1 %v1892_v61  ;;  %2326 = vmatprep.subr.mxu0 %v1924_v62  ;;  %v1872_v19 = vld [vmem:[#allocation4 + $0x90] sm:$0xff]  ;;  %v1887_v21 = vld [vmem:[#allocation4 + $0x80] sm:$0xff]  ;;  %v1871_v23 = vld [vmem:[#allocation4 + $0x78] sm:$0xff] }
 0xa7a   :  { %2292 = vmatpush3.msra.mxu1 %v1876_v63  ;;  %2327 = vmatpush3.msra.mxu0 %v1908_v0  ;;  %v1904_v20 = vld [vmem:[#allocation4 + $0x50] sm:$0xff]  ;;  %v1919_v22 = vld [vmem:[#allocation4 + $0x120] sm:$0xff]  ;;  %v1903_v24 = vld [vmem:[#allocation4 + $0xc8] sm:$0xff] }
 0xa7b   :  { %2293 = vmatprep.subr.mxu1 %v1891_v1  ;;  %2328 = vmatprep.subr.mxu0 %v1923_v2  ;;  %v1886_v25 = vld [vmem:[#allocation4 + $0x10] sm:$0xff]  ;;  %v1870_v27 = vld [vmem:[#allocation4 + $0x8] sm:$0xff]  ;;  %v1902_v28 = vld [vmem:[#allocation4 + $0xe0] sm:$0xff] }
 0xa7c   :  { %2294 = vmatpush3.msra.mxu1 %v1875_v4  ;;  %2329 = vmatpush3.msra.mxu0 %v1907_v7  ;;  %v1918_v26 = vld [vmem:[#allocation4 + $0xb0] sm:$0xff]  ;;  %v1885_v29 = vld [vmem:[#allocation4 + $0x48] sm:$0xff]  ;;  %v1869_v31 = vld [vmem:[#allocation4] sm:$0xff] }
 0xa7d   :  { %2295 = vmatprep.subr.mxu1 %v1890_v8  ;;  %2330 = vmatprep.subr.mxu0 %v1922_v9  ;;  %v1917_v30 = vld [vmem:[#allocation4 + $0xf0] sm:$0xff]  ;;  %v1901_v32 = vld [vmem:[#allocation4 + $0x108] sm:$0xff]  ;;  %v1884_v35 = vld [vmem:[#allocation4 + $0xb8] sm:$0xff] }
 0xa7e   :  { %2296 = vmatpush3.msra.mxu1 %v1874_v10  ;;  %2331 = vmatpush3.msra.mxu0 %v1906_v11  ;;  %v1916_v3 = vld [vmem:[#allocation4 + $0x58] sm:$0xff]  ;;  %v1868_v36 = vld [vmem:[#allocation4 + $0x28] sm:$0xff]  ;;  %v1900_v6 = vld [vmem:[#allocation4 + $0x140] sm:$0xff] }
 0xa7f   :  { %2297 = vmatprep.subr.mxu1 %v1889_v12  ;;  %2332 = vmatprep.subr.mxu0 %v1921_v13  ;;  %v1883_v57 = vld [vmem:[#allocation4 + $0x38] sm:$0xff]  ;;  %v1867_v44 = vld [vmem:[#allocation4 + $0x130] sm:$0xff]  ;;  %v1899_v59 = vld [vmem:[#allocation4 + $0x168] sm:$0xff] }
 0xa80   :  { %2298 = vmatpush3.msra.mxu1 %v1873_v14  ;;  %2333 = vmatpush3.msra.mxu0 %v1905_v16  ;;  %v1915_v37 = vld [vmem:[#allocation4 + $0x1d8] sm:$0xff]  ;;  %v1882_v38 = vld [vmem:[#allocation4 + $0x100] sm:$0xff]  ;;  %vm2087_vm9 = vmand %vm2085_vm7, %vm2086_vm8 }
 0xa81   :  { %2299 = vmatprep.subr.mxu1 %v1888_v17  ;;  %2334 = vmatprep.subr.mxu0 %v1920_v18  ;;  %v1914_v39 = vld [vmem:[#allocation4 + $0x1c0] sm:$0xff]  ;;  %v1866_v40 = vld [vmem:[#allocation4 + $0xf8] sm:$0xff] }
 0xa82   :  { %2300 = vmatpush3.msra.mxu1 %v1872_v19  ;;  %2335 = vmatpush3.msra.mxu0 %v1904_v20  ;;  %v1898_v43 = vld [vmem:[#allocation4 + $0x160] sm:$0xff] }
 0xa83   :  { %2301 = vmatprep.subr.mxu1 %v1887_v21  ;;  %2336 = vmatprep.subr.mxu0 %v1919_v22  ;;  %v2232_v47 = vld [vmem:[#allocation5] ss:$0 sm:$0xff] }
 0xa84   :  { %2302 = vmatpush3.msra.mxu1 %v1871_v23  ;;  %2337 = vmatpush3.msra.mxu0 %v1903_v24 }
 0xa85   :  { %2303 = vmatprep.subr.mxu1 %v1886_v25  ;;  %2338 = vmatprep.subr.mxu0 %v1918_v26 }
 0xa86   :  { %2304 = vmatpush3.msra.mxu1 %v1870_v27  ;;  %2339 = vmatpush3.msra.mxu0 %v1902_v28 }
 0xa87   :  { %2305 = vmatprep.subr.mxu1 %v1885_v29  ;;  %2340 = vmatprep.subr.mxu0 %v1917_v30 }
 0xa88   :  { %2306 = vmatpush3.msra.mxu1 %v1869_v31  ;;  %2341 = vmatpush3.msra.mxu0 %v1901_v32 }
 0xa89   :  { %2307 = vmatprep.subr.mxu1 %v1884_v35  ;;  %2342 = vmatprep.subr.mxu0 %v1916_v3 }
 0xa8a   :  { %2308 = vmatpush3.msra.mxu1 %v1868_v36  ;;  %2343 = vmatpush3.msra.mxu0 %v1900_v6 }
 0xa8b   :  { %2309 = vmatprep.subr.mxu1 %v1883_v57  ;;  %2344 = vmatprep.subr.mxu0 %v1915_v37 }
 0xa8c   :  { %2310 = vmatpush3.msra.mxu1 %v1867_v44  ;;  %2345 = vmatpush3.msra.mxu0 %v1899_v59 }
 0xa8d   :  { %2311 = vmatprep.subr.mxu1 %v1882_v38  ;;  %2346 = vmatprep.subr.mxu0 %v1914_v39 }
 0xa8e   :  { %2312 = vmatpush3.msra.mxu1 %v1866_v40  ;;  %2347 = vmatpush3.msra.mxu0 %v1898_v43 }
 0xa8f   :  { %2002 = vmatmul.mubr.f32.vlgmr.msra.gmra.mxu1 %v1856_v5  ;;  %2072 = vmatmul.mubr.f32.vlgmr.msra.gmra.mxu0 %v1858_v42 }
 0xb4f   :  { %v2313_v45 = vpop.f32.mrf.mxu1  ;;  %v2348_v46 = vpop.f32.mrf.mxu0 }
 0xb51   :  { %v2314_v48 = vpop.f32.mrf.mxu1  ;;  %v2349_v49 = vpop.f32.mrf.mxu0 }
 0xb52   :  { %v2315_v50 = vadd.f32 %v2314_v48, %v2313_v45  ;;  %v2350_v53 = vadd.f32 %v2349_v49, %v2348_v46 }
 0xb54   :  { %v2004_v51 = vadd.f32 %v2315_v50, %v2232_v47 }
 0xb56   :  { %v2074_v54 = vadd.f32 %v2350_v53, %v2004_v51 }
 0xb58   :  { %v2233_v55 = vmul.f32 -1.442695, %v2074_v54 }
 0xb5a   :  { %2408 = vpow2.f32 %v2233_v55 }
 0xb67   :  { %v2409_v56 = vpop.eup %2408 }
 0xb68   :  { %v2080_v58 = vadd.f32 1.0, %v2409_v56 }
 0xb6a   :  { %2410 = vrcp.f32 %v2080_v58 }
 0xb77   :  { %v2411_v34 = vpop.eup %2410 }
 0xb78   :  { %v2089_v5 = vsel %vm2087_vm9, %v2088_v33, %v2411_v34 }
 0xb79   :  { %2090 = vst [vmem:[%s3961_s19] sm:$0xff] %v2089_v5 }
 0xb7a   :  { %2095 = vsyncpa [#allocation8], 1 }
 0xb7b   :  { %2096 = vsyncpa [#allocation10], 1 }
 0xb7c   :  { %2097 = vsyncmov [#allocation6] }
 0xb7f   :  { %s2098_s18 = vpop.sfrf %2097 }
 0xb80   :  { %p2234_p11 = scmp.ne.s32.totalorder %s2098_s18, 0 }
 0xb82   :  { %2102 = shalt.err (%p2234_p11)  }
 0xb83   :  { %2104 = vsyncmov [#allocation6 + $0x1] }
 0xb86   :  { %s2105_s2 = vpop.sfrf %2104 }
 0xb87   :  { %p2235_p12 = scmp.ne.s32.totalorder %s2105_s2, 0 }
 0xb89   :  { %2109 = shalt.err (%p2235_p12)  }
 0xb8a   :  { %2111 = vsyncmov [#allocation6 + $0x2] }
 0xb8d   :  { %s2112_s23 = vpop.sfrf %2111 }
 0xb8e   :  { %p2236_p13 = scmp.ne.s32.totalorder %s2112_s23, 0 }
 0xb90   :  { %2116 = shalt.err (%p2236_p13)  }
 0xb91   :  { %2118 = vsyncmov [#allocation6 + $0x3] }
 0xb94   :  { %s2119_s15 = vpop.sfrf %2118 }
 0xb95   :  { %p2237_p0 = scmp.ne.s32.totalorder %s2119_s15, 0 }
 0xb97   :  { %2123 = shalt.err (%p2237_p0)  }

</bundles_post_ra>
